<compile_context>
chip_gen: v6e
topology: v6e:2x2x1
jax: 0.10.0
libtpu: 0.0.40
codegen_flags: <defaults>
</compile_context>

<pallas_src>
import jax
import jax.numpy as jnp
from jax import lax
from jax.experimental import pallas as pl
from jax.experimental.pallas import tpu as pltpu


def _seq_model_kernel(x_ref, wc_ref, bc_ref, wf_ref, bf_ref, out_ref):
    # Per grid step (one image):
    #   x_ref  : [H+2, W+2, C_in]  f32   zero-padded NHWC image
    #   wc_ref : [9, C_in, OUT_W]  bf16  conv weight, rows ordered (ky*3+kx, c_in)
    #   bc_ref : [1, OUT_W]        f32   conv bias on lanes [0, C_out), 0 elsewhere
    #   wf_ref : [OUT_W, OUT_W]    f32   identity-routing + fc weight (see pack_params)
    #   bf_ref : [1, OUT_W]        f32   fc bias on lanes [C_out, C_out+NC)
    #   out_ref: [1, 1, OUT_W]     f32   packed [feature | logits | 0] row
    Hp, Wp, C_in = x_ref.shape
    H, W = Hp - 2, Wp - 2
    P = H * W
    out_w = wc_ref.shape[-1]

    xpad = x_ref[...]  # load the padded image once; all slicing below is static

    # ---- Conv2d(3x3, pad=1) as 9 shifted MXU matmuls (im2col done in-kernel) ----
    acc = jnp.zeros((P, out_w), jnp.float32)
    for k in range(9):
        ky, kx = k // 3, k % 3
        xs = xpad[ky:ky + H, kx:kx + W, :].reshape(P, C_in)        # [P, C_in]
        acc = acc + jnp.dot(xs.astype(jnp.bfloat16), wc_ref[k],    # bf16 MXU,
                            preferred_element_type=jnp.float32)    # f32 accumulate

    # bias + ReLU in f32 (v5e VPU has no bf16 elementwise support)
    h = jnp.maximum(acc + bc_ref[...], 0.0)                        # [P, OUT_W]

    # global average pool: sublane reduction (MXU is the binding unit; XLU has slack)
    feat = jnp.sum(h, axis=0, keepdims=True) * (1.0 / P)           # [1, OUT_W]

    # fc + lane packing fused in one matmul:
    #   lanes [0, C_out)          <- feat (identity block of wf_ref)
    #   lanes [C_out, C_out + NC) <- feat @ w_fc.T + b_fc
    out_ref[0] = jnp.dot(feat, wf_ref[...],
                         preferred_element_type=jnp.float32) + bf_ref[...]


def pack_params(w_conv, b_conv, w_fc, b_fc):
    """One-time repack of PyTorch-layout weights into kernel layouts (model init).

    NOT part of the per-forward path (perf review item #1).
    """
    C_out, C_in, KH, KW = w_conv.shape
    NC = w_fc.shape[0]
    assert (KH, KW) == (3, 3), "kernel instantiates a 3x3, pad=1 conv backbone"
    OUT_W = 128 * pl.cdiv(C_out + NC, 128)      # lane-dense packed output width

    # conv weight: [C_out, C_in, 3, 3] -> [(ky*3+kx), C_in, OUT_W lanes], bf16 for MXU
    wc = jnp.transpose(w_conv, (2, 3, 1, 0)).reshape(9, C_in, C_out)
    wc3 = jnp.zeros((9, C_in, OUT_W), jnp.float32).at[:, :, :C_out].set(wc)
    wc3 = wc3.astype(jnp.bfloat16)
    bc = jnp.zeros((1, OUT_W), jnp.float32).at[0, :C_out].set(b_conv)

    # fc weight fused with an identity routing block: out = feat @ wf + bf produces
    # [feature | logits | 0] structurally (rows >= C_out are zero, so nothing leaks).
    wf = jnp.zeros((OUT_W, OUT_W), jnp.float32)
    wf = wf.at[:C_out, :C_out].set(jnp.eye(C_out, dtype=jnp.float32))
    wf = wf.at[:C_out, C_out:C_out + NC].set(w_fc.T)
    bf = jnp.zeros((1, OUT_W), jnp.float32).at[0, C_out:C_out + NC].set(b_fc)

    return {"wc3": wc3, "bc": bc, "wf": wf, "bf": bf,
            "c_out": int(C_out), "num_classes": int(NC)}


@jax.jit
def _forward_packed(x_nchw, wc3, bc, wf, bf):
    """Jitted per-call path: layout glue fuses with the pallas_call dispatch."""
    B, C_in, H, W = x_nchw.shape
    OUT_W = wf.shape[-1]
    Hp, Wp = H + 2, W + 2

    # NCHW -> zero-padded NHWC; fold batch into rows so every kernel ref is <= 3-D.
    x_nhwc = jnp.transpose(x_nchw, (0, 2, 3, 1))
    xpad = jnp.pad(x_nhwc, ((0, 0), (1, 1), (1, 1), (0, 0)))
    xrows = xpad.reshape(B * Hp, Wp, C_in)                         # [B*(H+2), W+2, C_in]

    packed = pl.pallas_call(
        _seq_model_kernel,
        grid=(B,),
        in_specs=[
            pl.BlockSpec((Hp, Wp, C_in), lambda b: (b, 0, 0)),     # per-image tile
            pl.BlockSpec((9, C_in, OUT_W), lambda b: (0, 0, 0)),   # constant block idx:
            pl.BlockSpec((1, OUT_W), lambda b: (0, 0)),            #   weights DMA'd once,
            pl.BlockSpec((OUT_W, OUT_W), lambda b: (0, 0)),        #   stay VMEM-resident
            pl.BlockSpec((1, OUT_W), lambda b: (0, 0)),            #   across grid steps
        ],
        out_specs=pl.BlockSpec((1, 1, OUT_W), lambda b: (b, 0, 0)),
        out_shape=jax.ShapeDtypeStruct((B, 1, OUT_W), jnp.float32),
        compiler_params=pltpu.CompilerParams(
            dimension_semantics=("parallel",)),  # batch axis -> both TCs on v7x
    )(xrows, wc3, bc, wf, bf)
    return packed[:, 0, :]                                         # [B, OUT_W]


def sequential_model_forward(x_nchw, params, contrastive=False):
    """Sequential_model.forward: feature = backbone(x); logits = fc(feature)."""
    packed = _forward_packed(x_nchw, params["wc3"], params["bc"],
                             params["wf"], params["bf"])
    C_out, NC = params["c_out"], params["num_classes"]
    feature = packed[:, :C_out]
    logits = packed[:, C_out:C_out + NC]
    return (logits, feature) if contrastive else logits


def _reference_forward(x_nchw, w_conv, b_conv, w_fc, b_fc):
    """Pure-JAX reference matching PyTorch semantics (sanity check)."""
    y = lax.conv_general_dilated(
        x_nchw, w_conv, window_strides=(1, 1), padding=((1, 1), (1, 1)),
        dimension_numbers=("NCHW", "OIHW", "NCHW"))
    y = jnp.maximum(y + b_conv[None, :, None, None], 0.0)
    feat = jnp.mean(y, axis=(2, 3))                                # [B, C_out]
    return feat @ w_fc.T + b_fc[None, :], feat


if __name__ == "__main__":
    B, C_in, H, W = 2, 4, 16, 16
    C_out, NC = 8, 10

    key = jax.random.PRNGKey(0)
    k_x, k_wc, k_bc, k_wf, k_bf = jax.random.split(key, 5)
    x = jax.random.normal(k_x, (B, C_in, H, W), dtype=jnp.float32)
    w_conv = jax.random.normal(k_wc, (C_out, C_in, 3, 3), dtype=jnp.float32) * 0.1
    b_conv = jax.random.normal(k_bc, (C_out,), dtype=jnp.float32) * 0.1
    w_fc = jax.random.normal(k_wf, (NC, C_out), dtype=jnp.float32) * 0.1
    b_fc = jax.random.normal(k_bf, (NC,), dtype=jnp.float32) * 0.1

    params = pack_params(w_conv, b_conv, w_fc, b_fc)      # one-time, outside hot path
    logits, feature = sequential_model_forward(x, params, contrastive=True)
    jax.block_until_ready((logits, feature))

    ref_logits, ref_feat = _reference_forward(x, w_conv, b_conv, w_fc, b_fc)
    assert logits.shape == (B, NC)
    assert feature.shape == (B, C_out)
    # Tolerance leaves margin for the bf16 conv-matmul inputs (f32 accumulation).
    assert jnp.allclose(logits, ref_logits, rtol=2e-3, atol=2e-3), "logits mismatch"
    assert jnp.allclose(feature, ref_feat, rtol=2e-3, atol=2e-3), "feature mismatch"

    print("KERNEL_OK")
</pallas_src>

<mosaic_0001>
module attributes {stable_mosaic.version = 11 : i64} {
  func.func @_seq_model_kernel(%arg0: i32, %arg1: memref<18x18x4xf32, #tpu.memory_space<vmem>>, %arg2: memref<9x4x128xbf16, #tpu.memory_space<vmem>>, %arg3: memref<1x128xf32, #tpu.memory_space<vmem>>, %arg4: memref<128x128xf32, #tpu.memory_space<vmem>>, %arg5: memref<1x128xf32, #tpu.memory_space<vmem>>, %arg6: memref<1x1x128xf32, #tpu.memory_space<vmem>>) attributes {dimension_semantics = [#tpu.dimension_semantics<parallel>], iteration_bounds = array<i64: 2>, scalar_prefetch = 0 : i64, scratch_operands = 0 : i64, tpu.core_type = #tpu.core_type<tc>, window_params = [{transform_indices = @transform_0, window_bounds = array<i64: 18, 18, 4>}, {pipeline_mode = #tpu.pipeline_mode<synchronous>, transform_indices = @transform_1, window_bounds = array<i64: 9, 4, 128>}, {pipeline_mode = #tpu.pipeline_mode<synchronous>, transform_indices = @transform_2, window_bounds = array<i64: 1, 128>}, {pipeline_mode = #tpu.pipeline_mode<synchronous>, transform_indices = @transform_3, window_bounds = array<i64: 128, 128>}, {pipeline_mode = #tpu.pipeline_mode<synchronous>, transform_indices = @transform_4, window_bounds = array<i64: 1, 128>}, {transform_indices = @transform_5, window_bounds = array<i64: 1, 1, 128>}]} {
    %c0 = arith.constant 0 : index
    %c0_0 = arith.constant 0 : index
    %c0_1 = arith.constant 0 : index
    %0 = vector.load %arg1[%c0, %c0_0, %c0_1] : memref<18x18x4xf32, #tpu.memory_space<vmem>>, vector<18x18x4xf32>
    %cst = arith.constant 0.000000e+00 : f32
    %1 = vector.broadcast %cst : f32 to vector<256x128xf32>
    %2 = vector.extract_strided_slice %0 {offsets = [0, 0, 0], sizes = [16, 16, 4], strides = [1, 1, 1]} : vector<18x18x4xf32> to vector<16x16x4xf32>
    %3 = vector.shape_cast %2 : vector<16x16x4xf32> to vector<256x4xf32>
    %4 = arith.truncf %3 : vector<256x4xf32> to vector<256x4xbf16>
    %c0_2 = arith.constant 0 : index
    %c0_3 = arith.constant 0 : index
    %c0_4 = arith.constant 0 : index
    %5 = vector.load %arg2[%c0_2, %c0_3, %c0_4] : memref<9x4x128xbf16, #tpu.memory_space<vmem>>, vector<1x4x128xbf16>
    %6 = vector.shape_cast %5 : vector<1x4x128xbf16> to vector<4x128xbf16>
    %cst_5 = arith.constant dense<0.000000e+00> : vector<256x128xf32>
    %7 = tpu.matmul %4, %6, %cst_5 {dimension_numbers = #tpu.dot_dimension_numbers<[1], [0], [0], [1], [0, 0, 1, 1], [], []>} : vector<256x4xbf16>, vector<4x128xbf16>, vector<256x128xf32> -> vector<256x128xf32>
    %8 = arith.addf %1, %7 : vector<256x128xf32>
    %9 = vector.extract_strided_slice %0 {offsets = [0, 1, 0], sizes = [16, 16, 4], strides = [1, 1, 1]} : vector<18x18x4xf32> to vector<16x16x4xf32>
    %10 = vector.shape_cast %9 : vector<16x16x4xf32> to vector<256x4xf32>
    %11 = arith.truncf %10 : vector<256x4xf32> to vector<256x4xbf16>
    %c1 = arith.constant 1 : index
    %c0_6 = arith.constant 0 : index
    %c0_7 = arith.constant 0 : index
    %12 = vector.load %arg2[%c1, %c0_6, %c0_7] : memref<9x4x128xbf16, #tpu.memory_space<vmem>>, vector<1x4x128xbf16>
    %13 = vector.shape_cast %12 : vector<1x4x128xbf16> to vector<4x128xbf16>
    %cst_8 = arith.constant dense<0.000000e+00> : vector<256x128xf32>
    %14 = tpu.matmul %11, %13, %cst_8 {dimension_numbers = #tpu.dot_dimension_numbers<[1], [0], [0], [1], [0, 0, 1, 1], [], []>} : vector<256x4xbf16>, vector<4x128xbf16>, vector<256x128xf32> -> vector<256x128xf32>
    %15 = arith.addf %8, %14 : vector<256x128xf32>
    %16 = vector.extract_strided_slice %0 {offsets = [0, 2, 0], sizes = [16, 16, 4], strides = [1, 1, 1]} : vector<18x18x4xf32> to vector<16x16x4xf32>
    %17 = vector.shape_cast %16 : vector<16x16x4xf32> to vector<256x4xf32>
    %18 = arith.truncf %17 : vector<256x4xf32> to vector<256x4xbf16>
    %c2 = arith.constant 2 : index
    %c0_9 = arith.constant 0 : index
    %c0_10 = arith.constant 0 : index
    %19 = vector.load %arg2[%c2, %c0_9, %c0_10] : memref<9x4x128xbf16, #tpu.memory_space<vmem>>, vector<1x4x128xbf16>
    %20 = vector.shape_cast %19 : vector<1x4x128xbf16> to vector<4x128xbf16>
    %cst_11 = arith.constant dense<0.000000e+00> : vector<256x128xf32>
    %21 = tpu.matmul %18, %20, %cst_11 {dimension_numbers = #tpu.dot_dimension_numbers<[1], [0], [0], [1], [0, 0, 1, 1], [], []>} : vector<256x4xbf16>, vector<4x128xbf16>, vector<256x128xf32> -> vector<256x128xf32>
    %22 = arith.addf %15, %21 : vector<256x128xf32>
    %23 = vector.extract_strided_slice %0 {offsets = [1, 0, 0], sizes = [16, 16, 4], strides = [1, 1, 1]} : vector<18x18x4xf32> to vector<16x16x4xf32>
    %24 = vector.shape_cast %23 : vector<16x16x4xf32> to vector<256x4xf32>
    %25 = arith.truncf %24 : vector<256x4xf32> to vector<256x4xbf16>
    %c3 = arith.constant 3 : index
    %c0_12 = arith.constant 0 : index
    %c0_13 = arith.constant 0 : index
    %26 = vector.load %arg2[%c3, %c0_12, %c0_13] : memref<9x4x128xbf16, #tpu.memory_space<vmem>>, vector<1x4x128xbf16>
    %27 = vector.shape_cast %26 : vector<1x4x128xbf16> to vector<4x128xbf16>
    %cst_14 = arith.constant dense<0.000000e+00> : vector<256x128xf32>
    %28 = tpu.matmul %25, %27, %cst_14 {dimension_numbers = #tpu.dot_dimension_numbers<[1], [0], [0], [1], [0, 0, 1, 1], [], []>} : vector<256x4xbf16>, vector<4x128xbf16>, vector<256x128xf32> -> vector<256x128xf32>
    %29 = arith.addf %22, %28 : vector<256x128xf32>
    %30 = vector.extract_strided_slice %0 {offsets = [1, 1, 0], sizes = [16, 16, 4], strides = [1, 1, 1]} : vector<18x18x4xf32> to vector<16x16x4xf32>
    %31 = vector.shape_cast %30 : vector<16x16x4xf32> to vector<256x4xf32>
    %32 = arith.truncf %31 : vector<256x4xf32> to vector<256x4xbf16>
    %c4 = arith.constant 4 : index
    %c0_15 = arith.constant 0 : index
    %c0_16 = arith.constant 0 : index
    %33 = vector.load %arg2[%c4, %c0_15, %c0_16] : memref<9x4x128xbf16, #tpu.memory_space<vmem>>, vector<1x4x128xbf16>
    %34 = vector.shape_cast %33 : vector<1x4x128xbf16> to vector<4x128xbf16>
    %cst_17 = arith.constant dense<0.000000e+00> : vector<256x128xf32>
    %35 = tpu.matmul %32, %34, %cst_17 {dimension_numbers = #tpu.dot_dimension_numbers<[1], [0], [0], [1], [0, 0, 1, 1], [], []>} : vector<256x4xbf16>, vector<4x128xbf16>, vector<256x128xf32> -> vector<256x128xf32>
    %36 = arith.addf %29, %35 : vector<256x128xf32>
    %37 = vector.extract_strided_slice %0 {offsets = [1, 2, 0], sizes = [16, 16, 4], strides = [1, 1, 1]} : vector<18x18x4xf32> to vector<16x16x4xf32>
    %38 = vector.shape_cast %37 : vector<16x16x4xf32> to vector<256x4xf32>
    %39 = arith.truncf %38 : vector<256x4xf32> to vector<256x4xbf16>
    %c5 = arith.constant 5 : index
    %c0_18 = arith.constant 0 : index
    %c0_19 = arith.constant 0 : index
    %40 = vector.load %arg2[%c5, %c0_18, %c0_19] : memref<9x4x128xbf16, #tpu.memory_space<vmem>>, vector<1x4x128xbf16>
    %41 = vector.shape_cast %40 : vector<1x4x128xbf16> to vector<4x128xbf16>
    %cst_20 = arith.constant dense<0.000000e+00> : vector<256x128xf32>
    %42 = tpu.matmul %39, %41, %cst_20 {dimension_numbers = #tpu.dot_dimension_numbers<[1], [0], [0], [1], [0, 0, 1, 1], [], []>} : vector<256x4xbf16>, vector<4x128xbf16>, vector<256x128xf32> -> vector<256x128xf32>
    %43 = arith.addf %36, %42 : vector<256x128xf32>
    %44 = vector.extract_strided_slice %0 {offsets = [2, 0, 0], sizes = [16, 16, 4], strides = [1, 1, 1]} : vector<18x18x4xf32> to vector<16x16x4xf32>
    %45 = vector.shape_cast %44 : vector<16x16x4xf32> to vector<256x4xf32>
    %46 = arith.truncf %45 : vector<256x4xf32> to vector<256x4xbf16>
    %c6 = arith.constant 6 : index
    %c0_21 = arith.constant 0 : index
    %c0_22 = arith.constant 0 : index
    %47 = vector.load %arg2[%c6, %c0_21, %c0_22] : memref<9x4x128xbf16, #tpu.memory_space<vmem>>, vector<1x4x128xbf16>
    %48 = vector.shape_cast %47 : vector<1x4x128xbf16> to vector<4x128xbf16>
    %cst_23 = arith.constant dense<0.000000e+00> : vector<256x128xf32>
    %49 = tpu.matmul %46, %48, %cst_23 {dimension_numbers = #tpu.dot_dimension_numbers<[1], [0], [0], [1], [0, 0, 1, 1], [], []>} : vector<256x4xbf16>, vector<4x128xbf16>, vector<256x128xf32> -> vector<256x128xf32>
    %50 = arith.addf %43, %49 : vector<256x128xf32>
    %51 = vector.extract_strided_slice %0 {offsets = [2, 1, 0], sizes = [16, 16, 4], strides = [1, 1, 1]} : vector<18x18x4xf32> to vector<16x16x4xf32>
    %52 = vector.shape_cast %51 : vector<16x16x4xf32> to vector<256x4xf32>
    %53 = arith.truncf %52 : vector<256x4xf32> to vector<256x4xbf16>
    %c7 = arith.constant 7 : index
    %c0_24 = arith.constant 0 : index
    %c0_25 = arith.constant 0 : index
    %54 = vector.load %arg2[%c7, %c0_24, %c0_25] : memref<9x4x128xbf16, #tpu.memory_space<vmem>>, vector<1x4x128xbf16>
    %55 = vector.shape_cast %54 : vector<1x4x128xbf16> to vector<4x128xbf16>
    %cst_26 = arith.constant dense<0.000000e+00> : vector<256x128xf32>
    %56 = tpu.matmul %53, %55, %cst_26 {dimension_numbers = #tpu.dot_dimension_numbers<[1], [0], [0], [1], [0, 0, 1, 1], [], []>} : vector<256x4xbf16>, vector<4x128xbf16>, vector<256x128xf32> -> vector<256x128xf32>
    %57 = arith.addf %50, %56 : vector<256x128xf32>
    %58 = vector.extract_strided_slice %0 {offsets = [2, 2, 0], sizes = [16, 16, 4], strides = [1, 1, 1]} : vector<18x18x4xf32> to vector<16x16x4xf32>
    %59 = vector.shape_cast %58 : vector<16x16x4xf32> to vector<256x4xf32>
    %60 = arith.truncf %59 : vector<256x4xf32> to vector<256x4xbf16>
    %c8 = arith.constant 8 : index
    %c0_27 = arith.constant 0 : index
    %c0_28 = arith.constant 0 : index
    %61 = vector.load %arg2[%c8, %c0_27, %c0_28] : memref<9x4x128xbf16, #tpu.memory_space<vmem>>, vector<1x4x128xbf16>
    %62 = vector.shape_cast %61 : vector<1x4x128xbf16> to vector<4x128xbf16>
    %cst_29 = arith.constant dense<0.000000e+00> : vector<256x128xf32>
    %63 = tpu.matmul %60, %62, %cst_29 {dimension_numbers = #tpu.dot_dimension_numbers<[1], [0], [0], [1], [0, 0, 1, 1], [], []>} : vector<256x4xbf16>, vector<4x128xbf16>, vector<256x128xf32> -> vector<256x128xf32>
    %64 = arith.addf %57, %63 : vector<256x128xf32>
    %c0_30 = arith.constant 0 : index
    %c0_31 = arith.constant 0 : index
    %65 = vector.load %arg3[%c0_30, %c0_31] : memref<1x128xf32, #tpu.memory_space<vmem>>, vector<1x128xf32>
    %66 = vector.broadcast %65 : vector<1x128xf32> to vector<256x128xf32>
    %67 = arith.addf %64, %66 : vector<256x128xf32>
    %cst_32 = arith.constant 0.000000e+00 : f32
    %68 = vector.broadcast %cst_32 : f32 to vector<256x128xf32>
    %69 = arith.maximumf %67, %68 : vector<256x128xf32>
    %cst_33 = arith.constant dense<0.000000e+00> : vector<128xf32>
    %70 = vector.multi_reduction <add>, %69, %cst_33 [0] : vector<256x128xf32> to vector<128xf32>
    %71 = vector.shape_cast %70 : vector<128xf32> to vector<1x128xf32>
    %cst_34 = arith.constant 3.906250e-03 : f32
    %72 = vector.broadcast %cst_34 : f32 to vector<1x128xf32>
    %73 = arith.mulf %71, %72 : vector<1x128xf32>
    %c0_35 = arith.constant 0 : index
    %c0_36 = arith.constant 0 : index
    %74 = vector.load %arg4[%c0_35, %c0_36] : memref<128x128xf32, #tpu.memory_space<vmem>>, vector<128x128xf32>
    %cst_37 = arith.constant dense<0.000000e+00> : vector<1x128xf32>
    %75 = tpu.matmul %73, %74, %cst_37 {dimension_numbers = #tpu.dot_dimension_numbers<[1], [0], [0], [1], [0, 0, 1, 1], [], []>} : vector<1x128xf32>, vector<128x128xf32>, vector<1x128xf32> -> vector<1x128xf32>
    %c0_38 = arith.constant 0 : index
    %c0_39 = arith.constant 0 : index
    %76 = vector.load %arg5[%c0_38, %c0_39] : memref<1x128xf32, #tpu.memory_space<vmem>>, vector<1x128xf32>
    %77 = arith.addf %75, %76 : vector<1x128xf32>
    %c0_40 = arith.constant 0 : index
    %c0_41 = arith.constant 0 : index
    %c0_42 = arith.constant 0 : index
    %78 = vector.load %arg6[%c0_40, %c0_41, %c0_42] : memref<1x1x128xf32, #tpu.memory_space<vmem>>, vector<1x1x128xf32>
    %79 = vector.shape_cast %78 : vector<1x1x128xf32> to vector<1x128xf32>
    %80 = vector.shape_cast %77 : vector<1x128xf32> to vector<1x1x128xf32>
    tpu.vector_store %arg6[%c0_40, %c0_41, %c0_42], %80 {strides = array<i32>} : memref<1x1x128xf32, #tpu.memory_space<vmem>>, vector<1x1x128xf32>,
    return
  }
  func.func @transform_0(%arg0: i32) -> (i32, i32, i32) {
    %c0_i32 = arith.constant 0 : i32
    %c0_i32_0 = arith.constant 0 : i32
    %c0_i32_1 = arith.constant 0 : i32
    return %arg0, %c0_i32, %c0_i32_0 : i32, i32, i32
  }
  func.func @transform_1(%arg0: i32) -> (i32, i32, i32) {
    %c0_i32 = arith.constant 0 : i32
    %c0_i32_0 = arith.constant 0 : i32
    %c0_i32_1 = arith.constant 0 : i32
    %c0_i32_2 = arith.constant 0 : i32
    return %c0_i32, %c0_i32_0, %c0_i32_1 : i32, i32, i32
  }
  func.func @transform_2(%arg0: i32) -> (i32, i32) {
    %c0_i32 = arith.constant 0 : i32
    %c0_i32_0 = arith.constant 0 : i32
    %c0_i32_1 = arith.constant 0 : i32
    return %c0_i32, %c0_i32_0 : i32, i32
  }
  func.func @transform_3(%arg0: i32) -> (i32, i32) {
    %c0_i32 = arith.constant 0 : i32
    %c0_i32_0 = arith.constant 0 : i32
    %c0_i32_1 = arith.constant 0 : i32
    return %c0_i32, %c0_i32_0 : i32, i32
  }
  func.func @transform_4(%arg0: i32) -> (i32, i32) {
    %c0_i32 = arith.constant 0 : i32
    %c0_i32_0 = arith.constant 0 : i32
    %c0_i32_1 = arith.constant 0 : i32
    return %c0_i32, %c0_i32_0 : i32, i32
  }
  func.func @transform_5(%arg0: i32) -> (i32, i32, i32) {
    %c0_i32 = arith.constant 0 : i32
    %c0_i32_0 = arith.constant 0 : i32
    %c0_i32_1 = arith.constant 0 : i32
    return %arg0, %c0_i32, %c0_i32_0 : i32, i32, i32
  }
}

</mosaic_0001>

<bundles_post_ra>
// kernel: _forward_packed.1
= control target key start
LH: loop header
LB: loop body
LE: loop exit
PB: predicated region body
PF: predicated region fallthrough
CT: control target
= control target key end

     0   :  { %10 = vsyncpa [#allocation3], 0  ;;  %s5004_s0 = inlined_call_operand.vmem [shape: f32[36,18,4], index: 0, kind: input, shape index: {}]   ;;  %s5005_s1 = inlined_call_operand.vmem [shape: bf16[9,4,128], index: 1, kind: input, shape index: {}]   ;;  %s5006_s2 = inlined_call_operand.vmem [shape: f32[1,128], index: 2, kind: input, shape index: {}]   ;;  %s5007_s3 = inlined_call_operand.vmem [shape: f32[128,128], index: 3, kind: input, shape index: {}]   ;;  %s5008_s4 = inlined_call_operand.vmem [shape: f32[1,128], index: 4, kind: input, shape index: {}]   ;;  %s5009_s5 = inlined_call_operand.hbm [shape: f32[2,1,128], index: 5, kind: output, shape index: {}]  }
   0x1   :  { %12 = vsyncpa [#allocation3 + $0x1], 0  ;;  %s3611_s18 = smov 0   ;;  %s3613_s19 = smov 0  }
   0x2   :  { %s3615_s20 = smov 0   ;;  %s3617_s21 = smov 0  }
   0x3 LB: > { %s3632_s22 = sadd.s32 4294967295, %s3576_s21   ;;  %s2790_s23 = sadd.s32 4294967294, %s3576_s21   ;;  %s3576_s21 = sphi %s3617_s21, %s5130_s21   ;;  %s3572_s20 = sphi %s3615_s20, %s5129_s20   ;;  %s3568_s19 = sphi %s3613_s19, %s5128_s19   ;;  %s3564_s18 = sphi %s3611_s18, %s5127_s18  }
   0x4   : > { %s3636_s24 = sadd.s32 1, %s3576_s21   ;;  %s135_s25 = sadd.s32 1, %s3572_s20 }
   0x5   : > { %s132_s26 = ssub.s32 %s3576_s21, %s3636_s24  ;;  %p145_p0 = scmp.ne.s32.totalorder %s3572_s20, %s3568_s19 }
   0x6   : > { %p133_p1 = scmp.eq.s32.totalorder %s132_s26, 0  ;;  %p146_p2 = scmp.eq.s32.totalorder %s3632_s22, 1 }
   0x7   : > { %p151_p3 = scmp.ne.s32.totalorder %s3568_s19, %s3564_s18  ;;  %p152_p4 = scmp.eq.s32.totalorder %s2790_s23, 1 }
   0x8   : > { %s3647_s27 = scalar_select %p133_p1, %s3572_s20, %s135_s25  }
   0x9   : > { %p3649_p5 = por %p146_p2, %p145_p0  ;;  %p3653_p6 = por %p152_p4, %p151_p3 }
   0xa   : > { %p2793_p7 = scmp.ge.s32.totalorder %s3576_s21, 1  ;;  %p192_p8 = scmp.lt.s32.totalorder %s3576_s21, 3 }
   0xc   : > { %p193_p9 = pnand %p2793_p7, %p192_p8 }
   0xe   : > { %196 = sbr.rel (%p193_p9) target bundleno = 757 (0x2f5), region = 40 }
  0x13   : > { %v2795_v0 = vld [vmem:[%s5005_s1 + $0x2] sm:$0x3]  ;;  %vm527_vm0 = vcmask 1041408   ;;  %s220_s7 = smul.u32 18, %s3632_s22  ;;  %v2828_v2 = vld [vmem:[%s5005_s1 + $0x4] sm:$0x3] }
  0x14   : > { %3464 = vmatprep.subr.msk.bf16.mxu0 %vm527_vm0, %v2795_v0  ;;  %3465 = vmatprep.subr.msk.bf16.mxu1 %vm527_vm0, %v2795_v0  ;;  %v529_v1 = vsel %vm527_vm0, %v2795_v0, 0  ;;  %v298_v3 = vld [vmem:[%s5005_s1] sm:$0x3]  ;;  %vm347_vm1 = vcmask 1046528   ;;  %vm478_vm2 = vcmask 31744   ;;  %v1084_v30 = vsel %vm527_vm0, %v2828_v2, 0 }
  0x15   : > { %3122 = vmatpush3.bf16.msra.mxu0 %v529_v1  ;;  %3463 = vmatpush3.bf16.msra.mxu1 %v529_v1  ;;  %p221_p10 = scmp.lt.s32.totalorder %s220_s7, 35  ;;  %v741_v39 = vsel %vm527_vm0, %v298_v3, 0  ;;  %v3773_v51 = vld [vmem:[%s5005_s1 + $0x8] sm:$0x3]  ;;  %vm904_vm3 = vcmask 1045504   ;;  %vm3579_vm4 = vmmov 0  }
  0x16   : > { %3467 = vmatprep.subr.msk.bf16.mxu0 %vm527_vm0, %v2828_v2  ;;  %3466 = vmatprep.subr.msk.bf16.mxu1 %vm527_vm0, %v298_v3  ;;  %s218_s14 = sand.u32 1, %s3568_s19   ;;  %s2948_s17 = sshll.u32 %s3632_s22, 4 }
  0x17   : > { %s5132_s7 = smov (!%p221_p10, %s220_s7), 35  ;;  %s219_s23 = scalar_lea.vmem [#allocation2], %s218_s14 }
  0x18   : > { %s3474_s12 = smul.u32 24, %s5132_s7  ;;  %s2735_s25 = sshll.u32 %s219_s23, 4  ;;  %s2736_s25 = int_to_ptr.vmem [resolvable:$true] %s2735_s25 }
  0x19   : > { %s4969_s6 = scalar_lea.hbm %s5009_s5, %s2948_s17  ;;  %s2723_s7 = scalar_lea.sflag [#allocation3], %s218_s14 }
  0x1a   : > { %s3677_s15 = scalar_lea.vmem %s5004_s0, %s3474_s12  ;;  %s3516_s8 = scalar_lea.vmem %s2736_s25, 16 }
  0x1b   : > { %v3680_v4 = vld [vmem:[%s3677_s15] sm:$0xff]  ;;  %v3683_v5 = vld [vmem:[%s3677_s15 + $0x8] sm:$0xff]  ;;  %v3686_v6 = vld [vmem:[%s3677_s15 + $0x10] sm:$0x3]  ;;  %p3517_p11 = scmp.ne.s32.totalorder %s2736_s25, %s3516_s8  ;;  %s3580_s9 = smov [#allocation2]  }
  0x1c   : > { %v348_v7 = vrot.slane %v3680_v4, 1  ;;  %v349_v8 = vrot.slane %v3683_v5, 1  ;;  %v351_v9 = vrot.slane %v3686_v6, 1  ;;  %v3692_v10 = vld [vmem:[%s3677_s15 + $0xf0] sm:$0xff]  ;;  %v3695_v11 = vld [vmem:[%s3677_s15 + $0xf8] sm:$0xff]  ;;  %v3709_v19 = vld [vmem:[%s3677_s15 + $0x20] sm:$0xff] }
  0x1d   : > { %v3698_v12 = vld [vmem:[%s3677_s15 + $0x100] sm:$0x3]  ;;  %v398_v13 = vrot.slane %v3692_v10, 1  ;;  %v399_v14 = vrot.slane %v3695_v11, 1  ;;  %v3706_v18 = vld [vmem:[%s3677_s15 + $0x18] sm:$0xff]  ;;  %v354_v24 = vrot.slane %v3709_v19, 1  ;;  %p3518_p12 = pnand %p3517_p11, %p3649_p5 }
  0x1e   : > { %v350_v15 = vsel %vm347_vm1, %v348_v7, %v349_v8  ;;  %v352_v16 = vsel %vm347_vm1, %v349_v8, %v351_v9  ;;  %v401_v17 = vrot.slane %v3698_v12, 1  ;;  %v3712_v20 = vld [vmem:[%s3677_s15 + $0x28] sm:$0x3]  ;;  %v353_v23 = vrot.slane %v3706_v18, 1  ;;  %v3721_v26 = vld [vmem:[%s3677_s15 + $0x110] sm:$0xff]  ;;  %v3733_v32 = vld [vmem:[%s3677_s15 + $0x38] sm:$0xff] }
  0x1f   : > { %v460_v21 = vpack.c.bf16 %v352_v16, %v350_v15  ;;  %v400_v22 = vsel %vm347_vm1, %v398_v13, %v399_v14  ;;  %v3718_v25 = vld [vmem:[%s3677_s15 + $0x108] sm:$0xff]  ;;  %v3724_v27 = vld [vmem:[%s3677_s15 + $0x118] sm:$0x3]  ;;  %v356_v29 = vrot.slane %v3712_v20, 1  ;;  %v3730_v31 = vld [vmem:[%s3677_s15 + $0x30] sm:$0xff]  ;;  %v404_v41 = vrot.slane %v3721_v26, 1  ;;  %p3519_p13 = pneg %p3518_p12 }
  0x20   : > { %v402_v28 = vsel %vm347_vm1, %v399_v14, %v401_v17  ;;  %v3736_v33 = vld [vmem:[%s3677_s15 + $0x120] sm:$0xff]  ;;  %v355_v35 = vsel %vm347_vm1, %v353_v23, %v354_v24  ;;  %v403_v36 = vrot.slane %v3718_v25, 1  ;;  %v3747_v38 = vld [vmem:[%s3677_s15 + $0x128] sm:$0xff]  ;;  %v406_v42 = vrot.slane %v3724_v27, 1  ;;  %v3755_v44 = vld [vmem:[%s3677_s15 + $0x130] sm:$0x3] }
  0x21   : > { %3123 = vmatprep.mubr.msk.bf16.mxu0 %vm478_vm2, %v460_v21  ;;  %v3739_v34 = vpack.c.bf16 %v402_v28, %v400_v22  ;;  %v3744_v37 = vld [vmem:[%s3677_s15 + $0x40] sm:$0x3]  ;;  %v357_v40 = vsel %vm347_vm1, %v354_v24, %v356_v29  ;;  %v358_v43 = vrot.slane %v3730_v31, 1  ;;  %v3758_v45 = vld [vmem:[%s3677_s15 + $0x48] sm:$0xff]  ;;  %v359_v47 = vrot.slane %v3733_v32, 1  ;;  %v3768_v50 = vld [vmem:[%s3677_s15 + $0x50] sm:$0xff] }
  0x22   : > { %v3762_v46 = vpack.c.bf16 %v357_v40, %v355_v35  ;;  %v361_v48 = vrot.slane %v3744_v37, 1  ;;  %v408_v49 = vrot.slane %v3736_v33, 1  ;;  %v405_v52 = vsel %vm347_vm1, %v403_v36, %v404_v41  ;;  %v3780_v56 = vld [vmem:[%s3677_s15 + $0x58] sm:$0x3]  ;;  %v3786_v58 = vld [vmem:[%s3677_s15 + $0x140] sm:$0xff]  ;;  %v3802_v1 = vld [vmem:[%s3677_s15 + $0x68] sm:$0xff] }
  0x23   : > { %5043 = vst [vmem:[#allocation5_spill] sm:$0xff] %v3739_v34  ;;  %3143 = vmatprep.mubr.msk.bf16.mxu1 %vm478_vm2, %v3739_v34  ;;  %v407_v53 = vsel %vm347_vm1, %v404_v41, %v406_v42  ;;  %v409_v54 = vrot.slane %v3747_v38, 1  ;;  %v411_v55 = vrot.slane %v3755_v44, 1  ;;  %v3783_v57 = vld [vmem:[%s3677_s15 + $0x138] sm:$0xff]  ;;  %v360_v60 = vsel %vm347_vm1, %v358_v43, %v359_v47  ;;  %v3796_v63 = vld [vmem:[%s3677_s15 + $0x148] sm:$0x3] }
  0x24   : > { %5044 = vst [vmem:[#allocation6_spill] sm:$0xff] %v3762_v46  ;;  %3124 = vmatmul.mubr.msk.bf16.vlgmr.msra.gmra.mxu0 %vm478_vm2, %v3762_v46  ;;  %v3790_v59 = vpack.c.bf16 %v407_v53, %v405_v52  ;;  %v362_v61 = vsel %vm347_vm1, %v359_v47, %v361_v48  ;;  %v363_v62 = vrot.slane %v3758_v45, 1  ;;  %v3799_v0 = vld [vmem:[%s3677_s15 + $0x60] sm:$0xff]  ;;  %v364_v8 = vrot.slane %v3768_v50, 1  ;;  %v3810_v9 = vld [vmem:[%s3677_s15 + $0x70] sm:$0x3] }
  0x25   : > { %3190 = vmatpush3.bf16.msra.mxu0 %v1084_v30  ;;  %v3804_v2 = vpack.c.bf16 %v362_v61, %v360_v60  ;;  %v410_v3 = vsel %vm347_vm1, %v408_v49, %v409_v54  ;;  %v412_v7 = vsel %vm347_vm1, %v409_v54, %v411_v55  ;;  %v3813_v13 = vld [vmem:[%s3677_s15 + $0x150] sm:$0xff]  ;;  %v3818_v14 = vld [vmem:[%s5005_s1 + $0x6] sm:$0x3]  ;;  %v366_v16 = vrot.slane %v3780_v56, 1  ;;  %v3828_v22 = vld [vmem:[%s3677_s15 + $0x158] sm:$0xff]  ;;  %s3520_s22 = sshll.u32 %s3580_s9, 4  ;;  %s3521_s22 = int_to_ptr.vmem [resolvable:$false] %s3520_s22 }
  0x26   : > { %5045 = vst [vmem:[#allocation7_spill] sm:$0xff] %v3790_v59  ;;  %3144 = vmatmul.mubr.msk.bf16.vlgmr.msra.gmra.mxu1 %vm478_vm2, %v3790_v59  ;;  %v3822_v15 = vpack.c.bf16 %v412_v7, %v410_v3  ;;  %v413_v17 = vrot.slane %v3783_v57, 1  ;;  %v414_v21 = vrot.slane %v3786_v58, 1  ;;  %3469 = vmatprep.subr.msk.bf16.mxu0 %vm527_vm0, %v3773_v51  ;;  %v365_v23 = vsel %vm347_vm1, %v363_v62, %v364_v8  ;;  %v3839_v30 = vld [vmem:[%s3677_s15 + $0x160] sm:$0x3]  ;;  %v3842_v35 = vld [vmem:[%s3677_s15 + $0x78] sm:$0xff]  ;;  %p3523_p0 = scmp.lt.s32.totalorder %s2736_s25, %s3521_s22 }
  0x27   : > { %5046 = vst [vmem:[#allocation8_spill] sm:$0xff] %v3804_v2  ;;  %3127 = vmatprep.mubr.msk.bf16.mxu0 %vm478_vm2, %v3804_v2  ;;  %v416_v24 = vrot.slane %v3796_v63, 1  ;;  %3156 = vmatpush3.bf16.msra.mxu1 %v741_v39  ;;  %v368_v28 = vrot.slane %v3799_v0, 1  ;;  %v369_v29 = vrot.slane %v3802_v1, 1  ;;  %v367_v36 = vsel %vm347_vm1, %v364_v8, %v366_v16  ;;  %v3851_v42 = vld [vmem:[%s3677_s15 + $0x80] sm:$0xff]  ;;  %v3864_v53 = vld [vmem:[%s3677_s15 + $0x168] sm:$0xff] }
  0x28   : > { %5047 = vst [vmem:[#allocation9_spill] sm:$0xff] %v3822_v15  ;;  %3147 = vmatprep.mubr.msk.bf16.mxu1 %vm478_vm2, %v3822_v15  ;;  %v415_v40 = vsel %vm347_vm1, %v413_v17, %v414_v21  ;;  %v371_v39 = vrot.slane %v3810_v9, 1  ;;  %v418_v41 = vrot.slane %v3813_v13, 1  ;;  %v3854_v43 = vld [vmem:[%s3677_s15 + $0x88] sm:$0x3]  ;;  %3468 = vmatprep.subr.msk.bf16.mxu1 %vm527_vm0, %v3818_v14  ;;  %v3858_v47 = vpack.c.bf16 %v367_v36, %v365_v23  ;;  %v3867_v54 = vld [vmem:[%s3677_s15 + $0x170] sm:$0xff] }
  0x29   : > { %v417_v48 = vsel %vm347_vm1, %v414_v21, %v416_v24  ;;  %v370_v49 = vsel %vm347_vm1, %v368_v28, %v369_v29  ;;  %v419_v52 = vrot.slane %v3828_v22, 1  ;;  %v3870_v55 = vld [vmem:[%s3677_s15 + $0x178] sm:$0x3]  ;;  %v421_v62 = vrot.slane %v3839_v30, 1  ;;  %v3878_v7 = vld [vmem:[%s3677_s15 + $0x90] sm:$0xff]  ;;  %v3910_v15 = vld [vmem:[%s3677_s15 + $0xa8] sm:$0xff] }
  0x2a   : > { %5048 = vst [vmem:[#allocation10_spill] sm:$0xff] %v3858_v47  ;;  %v3872_v60 = vpack.c.bf16 %v417_v48, %v415_v40  ;;  %v372_v61 = vsel %vm347_vm1, %v369_v29, %v371_v39  ;;  %v373_v3 = vrot.slane %v3842_v35, 1  ;;  %v374_v17 = vrot.slane %v3851_v42, 1  ;;  %v3886_v23 = vld [vmem:[%s3677_s15 + $0x98] sm:$0xff]  ;;  %v3895_v40 = vld [vmem:[%s3677_s15 + $0xa0] sm:$0x3] }
  0x2b   : > { %v3880_v8 = vpack.c.bf16 %v372_v61, %v370_v49  ;;  %v420_v16 = vsel %vm347_vm1, %v418_v41, %v419_v52  ;;  %v376_v21 = vrot.slane %v3854_v43, 1  ;;  %v422_v24 = vsel %vm347_vm1, %v419_v52, %v421_v62  ;;  %v3913_v59 = vld [vmem:[%s3677_s15 + $0xb0] sm:$0xff]  ;;  %s3522_s10 = scalar_lea.vmem %s3521_s22, 32 }
  0x2c   : > { %5049 = vst [vmem:[#allocation11_spill] sm:$0xff] %v3872_v60  ;;  %3128 = vmatmul.mubr.msk.bf16.gmra.mxu0 %vm478_vm2, %v3858_v47  ;;  %v423_v28 = vrot.slane %v3864_v53, 1  ;;  %v424_v29 = vrot.slane %v3867_v54, 1  ;;  %v426_v36 = vrot.slane %v3870_v55, 1  ;;  %v3899_v39 = vpack.c.bf16 %v422_v24, %v420_v16  ;;  %v3916_v16 = vld [vmem:[%s3677_s15 + $0xb8] sm:$0x3]  ;;  %p3524_p1 = scmp.lt.s32.totalorder %s3522_s10, %s3516_s8 }
  0x2d   : > { %5050 = vst [vmem:[#allocation12_spill] sm:$0xff] %v3880_v8  ;;  %3131 = vmatprep.mubr.msk.bf16.mxu0 %vm478_vm2, %v3880_v8  ;;  %v375_v41 = vsel %vm347_vm1, %v373_v3, %v374_v17  ;;  %v377_v48 = vsel %vm347_vm1, %v374_v17, %v376_v21  ;;  %v378_v49 = vrot.slane %v3878_v7, 1  ;;  %v379_v62 = vrot.slane %v3886_v23, 1  ;;  %5052 = vst [vmem:[#allocation14_spill] sm:$0xff] %v3916_v16  ;;  %v3922_v17 = vld [vmem:[%s3677_s15 + $0xc0] sm:$0xff]  ;;  %v3925_v21 = vld [vmem:[%s3677_s15 + $0xc8] sm:$0xff] }
  0x2e   : > { %5051 = vst [vmem:[#allocation13_spill] sm:$0xff] %v3899_v39  ;;  %3148 = vmatmul.mubr.msk.bf16.gmra.mxu1 %vm478_vm2, %v3872_v60  ;;  %v425_v52 = vsel %vm347_vm1, %v423_v28, %v424_v29  ;;  %v427_v61 = vsel %vm347_vm1, %v424_v29, %v426_v36  ;;  %v381_v3 = vrot.slane %v3895_v40, 1  ;;  %v3928_v24 = vld [vmem:[%s3677_s15 + $0xd0] sm:$0x3]  ;;  %v3930_v28 = vpack.c.bf16 %v377_v48, %v375_v41  ;;  %p3525_p2 = por %p3524_p1, %p3523_p0 }
  0x2f   : > { %3151 = vmatprep.mubr.msk.bf16.mxu1 %vm478_vm2, %v3899_v39  ;;  %5053 = vst [vmem:[#allocation15_spill] sm:$0xff] %v3928_v24  ;;  %v3932_v29 = vpack.c.bf16 %v427_v61, %v425_v52  ;;  %v380_v36 = vsel %vm347_vm1, %v378_v49, %v379_v62  ;;  %v383_v39 = vrot.slane %v3910_v15, 1  ;;  %v384_v34 = vrot.slane %v3913_v59, 1 }
  0x30   : > { %5054 = vst [vmem:[#allocation16_spill] sm:$0xff] %v3930_v28  ;;  %v382_v60 = vsel %vm347_vm1, %v379_v62, %v381_v3  ;;  %v386_v8 = vrot.slane %v3916_v16, 1  ;;  %v388_v41 = vrot.slane %v3922_v17, 1  ;;  %v389_v48 = vrot.slane %v3925_v21, 1  ;;  %v3953_v62 = vld [vmem:[%s3677_s15 + $0xd8] sm:$0xff]  ;;  %v3956_v3 = vld [vmem:[%s3677_s15 + $0xe0] sm:$0xff]  ;;  %p3526_p3 = pnand %p3525_p2, %p3519_p13 }
  0x31   : > { %5055 = vst [vmem:[#allocation17_spill] sm:$0xff] %v3932_v29  ;;  %v3939_v47 = vpack.c.bf16 %v382_v60, %v380_v36  ;;  %v391_v52 = vrot.slane %v3928_v24, 1  ;;  %v282_v49 = vpack.c.bf16 %v3683_v5, %v3680_v4  ;;  %v385_v61 = vsel %vm347_vm1, %v383_v39, %v384_v34  ;;  %v3959_v36 = vld [vmem:[%s3677_s15 + $0xe8] sm:$0x3] }
  0x32   : > { %v387_v60 = vsel %vm347_vm1, %v384_v34, %v386_v8  ;;  %v390_v2 = vsel %vm347_vm1, %v388_v41, %v389_v48  ;;  %v905_v46 = vrot.slane %v3680_v4, 2  ;;  %v908_v39 = vrot.slane %v3686_v6, 2 }
  0x33   : > { %5056 = vst [vmem:[#allocation18_spill] sm:$0xff] %v3939_v47  ;;  %v3969_v34 = vpack.c.bf16 %v387_v60, %v385_v61  ;;  %v393_v8 = vrot.slane %v3953_v62, 1  ;;  %v394_v24 = vrot.slane %v3956_v3, 1  ;;  %v3978_v4 = vpack.c.bf16 %v3709_v19, %v3706_v18 }
  0x34   : > { %3132 = vmatmul.mubr.msk.bf16.gmra.mxu0 %vm478_vm2, %v3930_v28  ;;  %v392_v28 = vsel %vm347_vm1, %v389_v48, %v391_v52  ;;  %v910_v6 = vrot.slane %v3706_v18, 2  ;;  %v911_v41 = vrot.slane %v3709_v19, 2  ;;  %v913_v48 = vrot.slane %v3712_v20, 2 }
  0x35   : > { %3135 = vmatprep.mubr.msk.bf16.mxu0 %vm478_vm2, %v3939_v47  ;;  %v906_v47 = vrot.slane %v3683_v5, 2  ;;  %v3974_v16 = vpack.c.bf16 %v392_v28, %v390_v2  ;;  %v1286_v5 = vsel %vm527_vm0, %v3818_v14, 0  ;;  %v3987_v52 = vpack.c.bf16 %v3733_v32, %v3730_v31 }
  0x36   : > { %3152 = vmatmul.mubr.msk.bf16.gmra.mxu1 %vm478_vm2, %v3932_v29  ;;  %v396_v29 = vrot.slane %v3959_v36, 1  ;;  %v395_v2 = vsel %vm347_vm1, %v393_v8, %v394_v24  ;;  %v915_v18 = vrot.slane %v3730_v31, 2  ;;  %v916_v19 = vrot.slane %v3733_v32, 2 }
  0x37   : > { %3157 = vmatprep.mubr.msk.bf16.mxu1 %vm478_vm2, %v282_v49  ;;  %5057 = vst [vmem:[#allocation19_spill] sm:$0xff] %v3974_v16  ;;  %v907_v49 = vsel %vm904_vm3, %v905_v46, %v906_v47  ;;  %v909_v14 = vsel %vm904_vm3, %v906_v47, %v908_v39  ;;  %v918_v20 = vrot.slane %v3744_v37, 2  ;;  %v4002_v61 = vpack.c.bf16 %v3695_v11, %v3692_v10 }
  0x38   : > { %v397_v28 = vsel %vm347_vm1, %v394_v24, %v396_v29  ;;  %v4007_v24 = vld [vmem:[%s5005_s1 + $0xa] sm:$0x3]  ;;  %v1017_v31 = vpack.c.bf16 %v909_v14, %v907_v49  ;;  %v912_v32 = vsel %vm904_vm3, %v910_v6, %v911_v41  ;;  %v4016_v37 = vpack.c.bf16 %v3721_v26, %v3718_v25 }
  0x39   : > { %v4018_v46 = vpack.c.bf16 %v397_v28, %v395_v2  ;;  %v914_v47 = vsel %vm904_vm3, %v911_v41, %v913_v48  ;;  %v920_v29 = vrot.slane %v3758_v45, 2  ;;  %v921_v60 = vrot.slane %v3768_v50, 2 }
  0x3a   : > { %v917_v39 = vsel %vm904_vm3, %v915_v18, %v916_v19  ;;  %v919_v8 = vsel %vm904_vm3, %v916_v19, %v918_v20  ;;  %v4030_v6 = vpack.c.bf16 %v3747_v38, %v3736_v33  ;;  %v4034_v41 = vpack.c.bf16 %v3768_v50, %v3758_v45 }
  0x3b   : > { %5058 = vst [vmem:[#allocation20_spill] sm:$0xff] %v4018_v46  ;;  %v925_v48 = vrot.slane %v3799_v0, 2  ;;  %v926_v2 = vrot.slane %v3802_v1, 2  ;;  %v4040_v28 = vpack.c.bf16 %v3786_v58, %v3783_v57  ;;  %v958_v49 = vrot.slane %v3698_v12, 2 }
  0x3c   : > { %3136 = vmatmul.mubr.msk.bf16.gmra.mxu0 %vm478_vm2, %v3969_v34  ;;  %v4049_v14 = vpack.c.bf16 %v3851_v42, %v3842_v35  ;;  %v1498_v45 = vsel %vm527_vm0, %v3773_v51, 0  ;;  %v4055_v50 = vpack.c.bf16 %v914_v47, %v912_v32  ;;  %v4059_v18 = vpack.c.bf16 %v3886_v23, %v3878_v7 }
  0x3d   : > { %3139 = vmatprep.mubr.msk.bf16.mxu0 %vm478_vm2, %v3974_v16  ;;  %v4061_v12 = vpack.c.bf16 %v919_v8, %v917_v39  ;;  %v928_v19 = vrot.slane %v3810_v9, 2  ;;  %v955_v20 = vrot.slane %v3692_v10, 2  ;;  %v927_v32 = vsel %vm904_vm3, %v925_v48, %v926_v2 }
  0x3e   : > { %3158 = vmatmul.mubr.msk.bf16.vlgmr.msra.gmra.mxu1 %vm478_vm2, %v3978_v4  ;;  %v956_v47 = vrot.slane %v3695_v11, 2  ;;  %v4078_v39 = vpack.c.bf16 %v3867_v54, %v3864_v53  ;;  %v961_v9 = vrot.slane %v3721_v26, 2  ;;  %v963_v10 = vrot.slane %v3724_v27, 2 }
  0x3f   : > { %3161 = vmatprep.mubr.msk.bf16.mxu1 %vm478_vm2, %v3987_v52  ;;  %3224 = vmatpush3.bf16.msra.mxu1 %v1286_v5  ;;  %v923_v5 = vrot.slane %v3780_v56, 2  ;;  %v4045_v56 = vpack.c.bf16 %v3802_v1, %v3799_v0  ;;  %v4065_v0 = vpack.c.bf16 %v3828_v22, %v3813_v13  ;;  %v922_v1 = vsel %vm904_vm3, %v920_v29, %v921_v60 }
  0x40   : > { %3470 = vmatprep.subr.msk.bf16.mxu1 %vm527_vm0, %v4007_v24  ;;  %v965_v29 = vrot.slane %v3736_v33, 2  ;;  %v957_v8 = vsel %vm904_vm3, %v955_v20, %v956_v47  ;;  %v959_v11 = vsel %vm904_vm3, %v956_v47, %v958_v49  ;;  %v970_v48 = vrot.slane %v3783_v57, 2 }
  0x41   : > { %v924_v51 = vsel %vm904_vm3, %v921_v60, %v923_v5  ;;  %v966_v60 = vrot.slane %v3747_v38, 2  ;;  %v968_v5 = vrot.slane %v3755_v44, 2  ;;  %v964_v26 = vsel %vm904_vm3, %v961_v9, %v963_v10 }
  0x42   : > { %v971_v38 = vrot.slane %v3786_v58, 2  ;;  %v973_v49 = vrot.slane %v3796_v63, 2  ;;  %v975_v44 = vrot.slane %v3813_v13, 2  ;;  %v976_v57 = vrot.slane %v3828_v22, 2 }
  0x43   : > { %v967_v27 = vsel %vm904_vm3, %v965_v29, %v966_v60  ;;  %v969_v33 = vsel %vm904_vm3, %v966_v60, %v968_v5  ;;  %v978_v47 = vrot.slane %v3839_v30, 2  ;;  %v981_v13 = vrot.slane %v3867_v54, 2 }
  0x44   : > { %3140 = vmatmul.mubr.msk.bf16.gmra.mxu0 %vm478_vm2, %v4018_v46  ;;  %v4101_v20 = vpack.c.bf16 %v969_v33, %v967_v27  ;;  %v972_v58 = vsel %vm904_vm3, %v970_v48, %v971_v38  ;;  %v974_v63 = vsel %vm904_vm3, %v971_v38, %v973_v49  ;;  %v977_v30 = vsel %vm904_vm3, %v975_v44, %v976_v57  ;;  %v5060_v33 = vld [vmem:[#allocation14_spill] sm:$0xff] }
  0x45   : > { %3191 = vmatprep.mubr.msk.bf16.mxu0 %vm478_vm2, %v1017_v31  ;;  %v960_v31 = vrot.slane %v3718_v25, 2  ;;  %v4091_v25 = vpack.c.bf16 %v959_v11, %v957_v8  ;;  %v4119_v22 = vpack.c.bf16 %v974_v63, %v972_v58  ;;  %v983_v10 = vrot.slane %v3870_v55, 2 }
  0x46   : > { %3162 = vmatmul.mubr.msk.bf16.gmra.mxu1 %vm478_vm2, %v4034_v41  ;;  %v929_v29 = vsel %vm904_vm3, %v926_v2, %v928_v19  ;;  %v4135_v60 = vpack.c.bf16 %v924_v51, %v922_v1  ;;  %v930_v2 = vrot.slane %v3842_v35, 2  ;;  %v931_v19 = vrot.slane %v3851_v42, 2 }
  0x47   : > { %3165 = vmatprep.mubr.msk.bf16.mxu1 %vm478_vm2, %v4045_v56  ;;  %v962_v46 = vsel %vm904_vm3, %v960_v31, %v961_v9  ;;  %v4109_v31 = vld [vmem:[%s5005_s1 + $0xc] sm:$0x3]  ;;  %v979_v9 = vsel %vm904_vm3, %v976_v57, %v978_v47  ;;  %v4139_v8 = vpack.c.bf16 %v929_v29, %v927_v32  ;;  %v933_v11 = vrot.slane %v3854_v43, 2  ;;  %v5061_v47 = vld [vmem:[#allocation15_spill] sm:$0xff] }
  0x48   : > { %v4096_v16 = vpack.c.bf16 %v964_v26, %v962_v46  ;;  %v980_v46 = vrot.slane %v3864_v53, 2  ;;  %v4127_v53 = vpack.c.bf16 %v979_v9, %v977_v30  ;;  %v4146_v5 = vpack.c.bf16 %v3913_v59, %v3910_v15 }
  0x49   : > { %v935_v48 = vrot.slane %v3878_v7, 2  ;;  %v936_v26 = vrot.slane %v3886_v23, 2  ;;  %v938_v1 = vrot.slane %v3895_v40, 2  ;;  %v4153_v51 = vpack.c.bf16 %v3925_v21, %v3922_v17 }
  0x4a   : > { %v982_v54 = vsel %vm904_vm3, %v980_v46, %v981_v13  ;;  %v932_v35 = vsel %vm904_vm3, %v930_v2, %v931_v19  ;;  %v934_v42 = vsel %vm904_vm3, %v931_v19, %v933_v11  ;;  %v940_v32 = vrot.slane %v3910_v15, 2  ;;  %v5064_v2 = vld [vmem:[#allocation10_spill] sm:$0xff]  ;;  %v5066_v19 = vld [vmem:[#allocation16_spill] sm:$0xff] }
  0x4b   : > { %v937_v43 = vsel %vm904_vm3, %v935_v48, %v936_v26  ;;  %v939_v7 = vsel %vm904_vm3, %v936_v26, %v938_v1  ;;  %v4167_v23 = vpack.c.bf16 %v934_v42, %v932_v35  ;;  %v941_v27 = vrot.slane %v3913_v59, 2  ;;  %v5067_v11 = vld [vmem:[#allocation18_spill] sm:$0xff]  ;;  %v5068_v48 = vld [vmem:[#allocation19_spill] sm:$0xff]  ;;  %v5069_v26 = vld [vmem:[#allocation20_spill] sm:$0xff] }
  0x4c   : > { %3192 = vmatmul.mubr.msk.bf16.vlgmr.msra.gmra.mxu0 %vm478_vm2, %v4055_v50  ;;  %v4169_v40 = vpack.c.bf16 %v939_v7, %v937_v43  ;;  %v943_v38 = vrot.slane %v5060_v33, 2  ;;  %v4176_v49 = vpack.c.bf16 %v3956_v3, %v3953_v62  ;;  %v945_v44 = vrot.slane %v3922_v17, 2  ;;  %v5070_v1 = vld [vmem:[#allocation5_spill] sm:$0xff]  ;;  %v5071_v35 = vld [vmem:[#allocation7_spill] sm:$0xff]  ;;  %v278_v33 = vld [vmem:[%s3677_s15 + $0x190] sm:$0x3] }
  0x4d   : > { %3258 = vmatpush3.bf16.msra.mxu0 %v1498_v45  ;;  %3195 = vmatprep.mubr.msk.bf16.mxu0 %vm478_vm2, %v4061_v12  ;;  %v984_v45 = vsel %vm904_vm3, %v981_v13, %v983_v10  ;;  %v946_v57 = vrot.slane %v3925_v21, 2  ;;  %v948_v58 = vrot.slane %v5061_v47, 2  ;;  %v942_v59 = vsel %vm904_vm3, %v940_v32, %v941_v27  ;;  %v276_v42 = vld [vmem:[%s3677_s15 + $0x180] sm:$0xff]  ;;  %v277_v43 = vld [vmem:[%s3677_s15 + $0x188] sm:$0xff] }
  0x4e   : > { %3166 = vmatmul.mubr.msk.bf16.gmra.mxu1 %vm478_vm2, %v4049_v14  ;;  %3471 = vmatprep.subr.msk.bf16.mxu0 %vm527_vm0, %v4109_v31  ;;  %v4137_v55 = vpack.c.bf16 %v984_v45, %v982_v54  ;;  %v944_v15 = vsel %vm904_vm3, %v941_v27, %v943_v38  ;;  %v950_v13 = vrot.slane %v3953_v62, 2  ;;  %v951_v30 = vrot.slane %v3956_v3, 2  ;;  %v2930_v54 = vld [vmem:[%s5005_s1 + $0x10] sm:$0x3]  ;;  %v5063_v45 = vld [vmem:[#allocation8_spill] sm:$0xff]  ;;  %v5072_v32 = vld [vmem:[#allocation9_spill] sm:$0xff] }
  0x4f   : > { %3169 = vmatprep.mubr.msk.bf16.mxu1 %vm478_vm2, %v4059_v18  ;;  %v947_v63 = vsel %vm904_vm3, %v945_v44, %v946_v57  ;;  %v949_v17 = vsel %vm904_vm3, %v946_v57, %v948_v58  ;;  %v4193_v21 = vpack.c.bf16 %v944_v15, %v942_v59  ;;  %v953_v9 = vrot.slane %v3959_v36, 2  ;;  %v2913_v36 = vld [vmem:[%s5005_s1 + $0xe] sm:$0x3]  ;;  %v5073_v27 = vld [vmem:[#allocation11_spill] sm:$0xff]  ;;  %v5074_v47 = vld [vmem:[#allocation13_spill] sm:$0xff] }
  0x50   : > { %5059 = vst [vmem:[#allocation21_spill] sm:$0xff] %v4137_v55  ;;  %v4195_v46 = vpack.c.bf16 %v949_v17, %v947_v63  ;;  %v952_v10 = vsel %vm904_vm3, %v950_v13, %v951_v30  ;;  %v1707_v3 = vsel %vm527_vm0, %v4007_v24, 0  ;;  %v1909_v24 = vsel %vm527_vm0, %v4109_v31, 0  ;;  %v5065_v31 = vld [vmem:[#allocation12_spill] sm:$0xff]  ;;  %v5075_v59 = vld [vmem:[#allocation17_spill] sm:$0xff] }
  0x51   : > { %v954_v29 = vsel %vm904_vm3, %v951_v30, %v953_v9  ;;  %v4298_v7 = vpack.c.bf16 %v277_v43, %v276_v42  ;;  %v1484_v38 = vrot.slane %v276_v42, 1  ;;  %v1485_v44 = vrot.slane %v277_v43, 1 }
  0x52   : > { %v4210_v62 = vpack.c.bf16 %v954_v29, %v952_v10  ;;  %v1487_v57 = vrot.slane %v278_v33, 1  ;;  %v2121_v58 = vsel %vm527_vm0, %v2913_v36, 0  ;;  %v2330_v17 = vsel %vm527_vm0, %v2930_v54, 0 }
  0x53   : > { %v1486_v15 = vsel %vm347_vm1, %v1484_v38, %v1485_v44  ;;  %v1693_v13 = vrot.slane %v276_v42, 2  ;;  %v1696_v30 = vrot.slane %v278_v33, 2 }
  0x54   : > { %3196 = vmatmul.mubr.msk.bf16.gmra.mxu0 %vm478_vm2, %v4135_v60  ;;  %v1488_v63 = vsel %vm347_vm1, %v1485_v44, %v1487_v57 }
  0x55   : > { %3199 = vmatprep.mubr.msk.bf16.mxu0 %vm478_vm2, %v4139_v8 }
  0x56   : > { %3170 = vmatmul.mubr.msk.bf16.gmra.mxu1 %vm478_vm2, %v4146_v5 }
  0x57   : > { %3173 = vmatprep.mubr.msk.bf16.mxu1 %vm478_vm2, %v4153_v51 }
  0x5c   : > { %3200 = vmatmul.mubr.msk.bf16.gmra.mxu0 %vm478_vm2, %v4167_v23 }
  0x5d   : > { %3203 = vmatprep.mubr.msk.bf16.mxu0 %vm478_vm2, %v4169_v40 }
  0x5e   : > { %3174 = vmatmul.mubr.msk.bf16.gmra.mxu1 %vm478_vm2, %v4176_v49 }
  0x5f   : > { %3177 = vmatprep.mubr.msk.bf16.mxu1 %vm478_vm2, %v4002_v61 }
  0x64   : > { %3204 = vmatmul.mubr.msk.bf16.gmra.mxu0 %vm478_vm2, %v4193_v21 }
  0x65   : > { %3207 = vmatprep.mubr.msk.bf16.mxu0 %vm478_vm2, %v4195_v46 }
  0x66   : > { %3178 = vmatmul.mubr.msk.bf16.gmra.mxu1 %vm478_vm2, %v4016_v37 }
  0x67   : > { %3181 = vmatprep.mubr.msk.bf16.mxu1 %vm478_vm2, %v4030_v6 }
  0x6c   : > { %3208 = vmatmul.mubr.msk.bf16.gmra.mxu0 %vm478_vm2, %v4210_v62 }
  0x6d   : > { %3211 = vmatprep.mubr.msk.bf16.mxu0 %vm478_vm2, %v4091_v25 }
  0x6e   : > { %3182 = vmatmul.mubr.msk.bf16.gmra.mxu1 %vm478_vm2, %v4040_v28 }
  0x6f   : > { %3185 = vmatprep.mubr.msk.bf16.mxu1 %vm478_vm2, %v4065_v0 }
  0x74   : > { %3212 = vmatmul.mubr.msk.bf16.gmra.mxu0 %vm478_vm2, %v4096_v16 }
  0x75   : > { %3215 = vmatprep.mubr.msk.bf16.mxu0 %vm478_vm2, %v4101_v20 }
  0x76   : > { %3186 = vmatmul.mubr.msk.bf16.gmra.mxu1 %vm478_vm2, %v4078_v39 }
  0x77   : > { %3225 = vmatprep.mubr.msk.bf16.mxu1 %vm478_vm2, %v3978_v4  ;;  %v5062_v4 = vld [vmem:[#allocation6_spill] sm:$0xff] }
  0x7c   : > { %3216 = vmatmul.mubr.msk.bf16.gmra.mxu0 %vm478_vm2, %v4119_v22 }
  0x7d   : > { %3219 = vmatprep.mubr.msk.bf16.mxu0 %vm478_vm2, %v4127_v53 }
  0x7e   : > { %3226 = vmatmul.mubr.msk.bf16.vlgmr.msra.gmra.mxu1 %vm478_vm2, %v3987_v52 }
  0x7f   : > { %3229 = vmatprep.mubr.msk.bf16.mxu1 %vm478_vm2, %v4034_v41  ;;  %3292 = vmatpush3.bf16.msra.mxu1 %v1707_v3 }
  0x80   : > { %3472 = vmatprep.subr.msk.bf16.mxu1 %vm527_vm0, %v2913_v36 }
  0x84   : > { %3220 = vmatmul.mubr.msk.bf16.gmra.mxu0 %vm478_vm2, %v4137_v55 }
  0x85   : > { %3259 = vmatprep.mubr.msk.bf16.mxu0 %vm478_vm2, %v5062_v4 }
  0x86   : > { %3230 = vmatmul.mubr.msk.bf16.gmra.mxu1 %vm478_vm2, %v4045_v56 }
  0x87   : > { %3233 = vmatprep.mubr.msk.bf16.mxu1 %vm478_vm2, %v4049_v14 }
  0x8c   : > { %3260 = vmatmul.mubr.msk.bf16.vlgmr.msra.gmra.mxu0 %vm478_vm2, %v5063_v45 }
  0x8d   : > { %3326 = vmatpush3.bf16.msra.mxu0 %v1909_v24  ;;  %3263 = vmatprep.mubr.msk.bf16.mxu0 %vm478_vm2, %v5064_v2 }
  0x8e   : > { %3234 = vmatmul.mubr.msk.bf16.gmra.mxu1 %vm478_vm2, %v4059_v18  ;;  %3473 = vmatprep.subr.msk.bf16.mxu0 %vm527_vm0, %v2930_v54 }
  0x8f   : > { %3237 = vmatprep.mubr.msk.bf16.mxu1 %vm478_vm2, %v4146_v5 }
  0x94   : > { %3264 = vmatmul.mubr.msk.bf16.gmra.mxu0 %vm478_vm2, %v5065_v31 }
  0x95   : > { %3267 = vmatprep.mubr.msk.bf16.mxu0 %vm478_vm2, %v5066_v19 }
  0x96   : > { %3238 = vmatmul.mubr.msk.bf16.gmra.mxu1 %vm478_vm2, %v4153_v51 }
  0x97   : > { %3241 = vmatprep.mubr.msk.bf16.mxu1 %vm478_vm2, %v4176_v49 }
  0x9c   : > { %3268 = vmatmul.mubr.msk.bf16.gmra.mxu0 %vm478_vm2, %v5067_v11 }
  0x9d   : > { %3271 = vmatprep.mubr.msk.bf16.mxu0 %vm478_vm2, %v3969_v34 }
  0x9e   : > { %3242 = vmatmul.mubr.msk.bf16.gmra.mxu1 %vm478_vm2, %v4002_v61 }
  0x9f   : > { %3245 = vmatprep.mubr.msk.bf16.mxu1 %vm478_vm2, %v4016_v37 }
  0xa4   : > { %3272 = vmatmul.mubr.msk.bf16.gmra.mxu0 %vm478_vm2, %v5068_v48 }
  0xa5   : > { %3275 = vmatprep.mubr.msk.bf16.mxu0 %vm478_vm2, %v5069_v26 }
  0xa6   : > { %3246 = vmatmul.mubr.msk.bf16.gmra.mxu1 %vm478_vm2, %v4030_v6 }
  0xa7   : > { %3249 = vmatprep.mubr.msk.bf16.mxu1 %vm478_vm2, %v4040_v28 }
  0xac   : > { %3276 = vmatmul.mubr.msk.bf16.gmra.mxu0 %vm478_vm2, %v5070_v1 }
  0xad   : > { %3279 = vmatprep.mubr.msk.bf16.mxu0 %vm478_vm2, %v5071_v35 }
  0xae   : > { %3250 = vmatmul.mubr.msk.bf16.gmra.mxu1 %vm478_vm2, %v4065_v0 }
  0xaf   : > { %3253 = vmatprep.mubr.msk.bf16.mxu1 %vm478_vm2, %v4078_v39 }
  0xb4   : > { %3280 = vmatmul.mubr.msk.bf16.gmra.mxu0 %vm478_vm2, %v5072_v32 }
  0xb5   : > { %3283 = vmatprep.mubr.msk.bf16.mxu0 %vm478_vm2, %v5073_v27 }
  0xb6   : > { %3254 = vmatmul.mubr.msk.bf16.gmra.mxu1 %vm478_vm2, %v4298_v7 }
  0xb7   : > { %3293 = vmatprep.mubr.msk.bf16.mxu1 %vm478_vm2, %v4055_v50  ;;  %v4320_v50 = vpack.c.bf16 %v1488_v63, %v1486_v15 }
  0xbc   : > { %3284 = vmatmul.mubr.msk.bf16.gmra.mxu0 %vm478_vm2, %v5074_v47 }
  0xbd   : > { %3287 = vmatprep.mubr.msk.bf16.mxu0 %vm478_vm2, %v5075_v59 }
  0xbe   : > { %3294 = vmatmul.mubr.msk.bf16.vlgmr.msra.gmra.mxu1 %vm478_vm2, %v4061_v12 }
  0xbf   : > { %3297 = vmatprep.mubr.msk.bf16.mxu1 %vm478_vm2, %v4135_v60  ;;  %3360 = vmatpush3.bf16.msra.mxu1 %v2121_v58 }
  0xc4   : > { %3288 = vmatmul.mubr.msk.bf16.gmra.mxu0 %vm478_vm2, %v4320_v50 }
  0xc5   : > { %3327 = vmatprep.mubr.msk.bf16.mxu0 %vm478_vm2, %v3987_v52 }
  0xc6   : > { %3298 = vmatmul.mubr.msk.bf16.gmra.mxu1 %vm478_vm2, %v4139_v8 }
  0xc7   : > { %3301 = vmatprep.mubr.msk.bf16.mxu1 %vm478_vm2, %v4167_v23 }
  0xcc   : > { %3328 = vmatmul.mubr.msk.bf16.vlgmr.msra.gmra.mxu0 %vm478_vm2, %v4034_v41 }
  0xcd   : > { %3394 = vmatpush3.bf16.msra.mxu0 %v2330_v17  ;;  %3331 = vmatprep.mubr.msk.bf16.mxu0 %vm478_vm2, %v4045_v56  ;;  %v4415_v17 = vld [vmem:[%s3677_s15 + $0x1a0] sm:$0xff] }
  0xce   : > { %3302 = vmatmul.mubr.msk.bf16.gmra.mxu1 %vm478_vm2, %v4169_v40 }
  0xcf   : > { %3305 = vmatprep.mubr.msk.bf16.mxu1 %vm478_vm2, %v4193_v21 }
  0xd4   : > { %3332 = vmatmul.mubr.msk.bf16.gmra.mxu0 %vm478_vm2, %v4049_v14 }
  0xd5   : > { %3335 = vmatprep.mubr.msk.bf16.mxu0 %vm478_vm2, %v4059_v18 }
  0xd6   : > { %3306 = vmatmul.mubr.msk.bf16.gmra.mxu1 %vm478_vm2, %v4195_v46 }
  0xd7   : > { %3309 = vmatprep.mubr.msk.bf16.mxu1 %vm478_vm2, %v4210_v62 }
  0xdc   : > { %3336 = vmatmul.mubr.msk.bf16.gmra.mxu0 %vm478_vm2, %v4146_v5 }
  0xdd   : > { %3339 = vmatprep.mubr.msk.bf16.mxu0 %vm478_vm2, %v4153_v51 }
  0xde   : > { %3310 = vmatmul.mubr.msk.bf16.gmra.mxu1 %vm478_vm2, %v4091_v25 }
  0xdf   : > { %3313 = vmatprep.mubr.msk.bf16.mxu1 %vm478_vm2, %v4096_v16 }
  0xe4   : > { %v3125_v52 = vpop.f32.mrf.mxu0  ;;  %3340 = vmatmul.mubr.msk.bf16.gmra.mxu0 %vm478_vm2, %v4176_v49  ;;  %v1694_v49 = vrot.slane %v277_v43, 2 }
  0xe5   : > { %3343 = vmatprep.mubr.msk.bf16.mxu0 %vm478_vm2, %v4002_v61 }
  0xe6   : > { %v4359_v41 = vpop.f32.mrf.mxu1  ;;  %3314 = vmatmul.mubr.msk.bf16.gmra.mxu1 %vm478_vm2, %v4101_v20  ;;  %v565_v56 = vpop.f32.mrf.mxu0  ;;  %v1695_v3 = vsel %vm904_vm3, %v1693_v13, %v1694_v49  ;;  %v1697_v36 = vsel %vm904_vm3, %v1694_v49, %v1696_v30 }
  0xe7   : > { %3317 = vmatprep.mubr.msk.bf16.mxu1 %vm478_vm2, %v4119_v22 }
  0xe8   : > { %v4365_v14 = vpop.f32.mrf.mxu1  ;;  %v3126_v18 = vpop.f32.mrf.mxu0 }
  0xea   : > { %v4367_v5 = vpop.f32.mrf.mxu1  ;;  %v568_v51 = vpop.f32.mrf.mxu0 }
  0xec   : > { %v4369_v9 = vpop.f32.mrf.mxu1  ;;  %v3129_v61 = vpop.f32.mrf.mxu0  ;;  %3344 = vmatmul.mubr.msk.bf16.gmra.mxu0 %vm478_vm2, %v4016_v37 }
  0xed   : > { %3347 = vmatprep.mubr.msk.bf16.mxu0 %vm478_vm2, %v4030_v6  ;;  %v4387_v6 = vpack.c.bf16 %v1697_v36, %v1695_v3 }
  0xee   : > { %v4375_v10 = vpop.f32.mrf.mxu1  ;;  %3318 = vmatmul.mubr.msk.bf16.gmra.mxu1 %vm478_vm2, %v4127_v53  ;;  %v581_v29 = vpop.f32.mrf.mxu0 }
  0xef   : > { %3321 = vmatprep.mubr.msk.bf16.mxu1 %vm478_vm2, %v4137_v55  ;;  %5076 = vst [vmem:[#allocation14_spill] sm:$0xff] %v4387_v6 }
  0xf0   : > { %v4383_v4 = vpop.f32.mrf.mxu1  ;;  %v3130_v24 = vpop.f32.mrf.mxu0 }
  0xf2   : > { %v4385_v37 = vpop.f32.mrf.mxu1  ;;  %v584_v54 = vpop.f32.mrf.mxu0 }
  0xf4   : > { %v4389_v42 = vpop.f32.mrf.mxu1  ;;  %v3133_v43 = vpop.f32.mrf.mxu0  ;;  %3348 = vmatmul.mubr.msk.bf16.gmra.mxu0 %vm478_vm2, %v4040_v28 }
  0xf5   : > { %3351 = vmatprep.mubr.msk.bf16.mxu0 %vm478_vm2, %v4065_v0  ;;  %v4412_v0 = vld [vmem:[%s3677_s15 + $0x198] sm:$0xff] }
  0xf6   : > { %v4395_v33 = vpop.f32.mrf.mxu1  ;;  %3322 = vmatmul.mubr.msk.bf16.gmra.mxu1 %vm478_vm2, %v4387_v6  ;;  %v597_v38 = vpop.f32.mrf.mxu0 }
  0xf7   : > { %3361 = vmatprep.mubr.msk.bf16.mxu1 %vm478_vm2, %v5063_v45 }
  0xf8   : > { %v4401_v44 = vpop.f32.mrf.mxu1  ;;  %v3134_v57 = vpop.f32.mrf.mxu0 }
  0xf9   : > { %5077 = vst [vmem:[#allocation15_spill] sm:$0xff] %v4401_v44 }
  0xfa   : > { %v4403_v58 = vpop.f32.mrf.mxu1  ;;  %v600_v15 = vpop.f32.mrf.mxu0 }
  0xfb   : > { %5078 = vst [vmem:[#allocation6_spill] sm:$0xff] %v4403_v58 }
  0xfc   : > { %v4405_v63 = vpop.f32.mrf.mxu1  ;;  %v3137_v28 = vpop.f32.mrf.mxu0  ;;  %3352 = vmatmul.mubr.msk.bf16.gmra.mxu0 %vm478_vm2, %v4078_v39  ;;  %v1902_v39 = vpack.c.bf16 %v4415_v17, %v4412_v0 }
  0xfd   : > { %5079 = vst [vmem:[#allocation8_spill] sm:$0xff] %v4405_v63  ;;  %3355 = vmatprep.mubr.msk.bf16.mxu0 %vm478_vm2, %v4298_v7 }
  0xfe   : > { %v3159_v45 = vpop.f32.mrf.mxu1  ;;  %3362 = vmatmul.mubr.msk.bf16.vlgmr.msra.gmra.mxu1 %vm478_vm2, %v5064_v2  ;;  %v613_v13 = vpop.f32.mrf.mxu0 }
  0xff   : > { %v786_v49 = vadd.f32 %v3159_v45, %v3125_v52  ;;  %3365 = vmatprep.mubr.msk.bf16.mxu1 %vm478_vm2, %v5065_v31 }
 0x100   : > { %v777_v30 = vpop.f32.mrf.mxu1  ;;  %v3138_v3 = vpop.f32.mrf.mxu0 }
 0x101   : > { %v778_v36 = vadd.f32 %v777_v30, %v565_v56 }
 0x102   : > { %v3160_v7 = vpop.f32.mrf.mxu1  ;;  %v616_v6 = vpop.f32.mrf.mxu0 }
 0x103   : > { %v789_v63 = vadd.f32 %v3160_v7, %v3126_v18 }
 0x104   : > { %v780_v55 = vpop.f32.mrf.mxu1  ;;  %v4423_v58 = vpop.f32.mrf.mxu0  ;;  %3356 = vmatmul.mubr.msk.bf16.gmra.mxu0 %vm478_vm2, %v1902_v39 }
 0x105   : > { %v781_v2 = vadd.f32 %v780_v55, %v568_v51  ;;  %3395 = vmatprep.mubr.msk.bf16.mxu0 %vm478_vm2, %v4061_v12 }
 0x106   : > { %v3163_v52 = vpop.f32.mrf.mxu1  ;;  %3366 = vmatmul.mubr.msk.bf16.gmra.mxu1 %vm478_vm2, %v5066_v19  ;;  %v4430_v31 = vpop.f32.mrf.mxu0 }
 0x107   : > { %v802_v45 = vadd.f32 %v3163_v52, %v3129_v61  ;;  %3369 = vmatprep.mubr.msk.bf16.mxu1 %vm478_vm2, %v5067_v11 }
 0x108   : > { %v793_v56 = vpop.f32.mrf.mxu1  ;;  %v3142_v18 = vpop.f32.mrf.mxu0 }
 0x109   : > { %v794_v30 = vadd.f32 %v793_v56, %v581_v29 }
 0x10a   : > { %v3164_v7 = vpop.f32.mrf.mxu1  ;;  %v4434_v44 = vpop.f32.mrf.mxu0 }
 0x10b   : > { %v805_v55 = vadd.f32 %v3164_v7, %v3130_v24 }
 0x10c   : > { %v796_v51 = vpop.f32.mrf.mxu1  ;;  %v3193_v39 = vpop.f32.mrf.mxu0  ;;  %3396 = vmatmul.mubr.msk.bf16.vlgmr.msra.gmra.mxu0 %vm478_vm2, %v4135_v60 }
 0x10d   : > { %v797_v12 = vadd.f32 %v796_v51, %v584_v54  ;;  %v4438_v19 = vadd.f32 %v3193_v39, %v786_v49  ;;  %3399 = vmatprep.mubr.msk.bf16.mxu0 %vm478_vm2, %v4139_v8 }
 0x10e   : > { %v3167_v61 = vpop.f32.mrf.mxu1  ;;  %3370 = vmatmul.mubr.msk.bf16.gmra.mxu1 %vm478_vm2, %v3969_v34  ;;  %v1120_v11 = vpop.f32.mrf.mxu0 }
 0x10f   : > { %5080 = vst [vmem:[#allocation10_spill] sm:$0xff] %v4438_v19  ;;  %v818_v29 = vadd.f32 %v3167_v61, %v3133_v43  ;;  %v4444_v52 = vadd.f32 %v1120_v11, %v778_v36  ;;  %3373 = vmatprep.mubr.msk.bf16.mxu1 %vm478_vm2, %v5068_v48 }
 0x110   : > { %v809_v24 = vpop.f32.mrf.mxu1  ;;  %v3194_v56 = vpop.f32.mrf.mxu0 }
 0x111   : > { %v810_v60 = vadd.f32 %v809_v24, %v597_v38  ;;  %v4448_v54 = vadd.f32 %v3194_v56, %v789_v63 }
 0x112   : > { %v3168_v49 = vpop.f32.mrf.mxu1  ;;  %v1123_v7 = vpop.f32.mrf.mxu0 }
 0x113   : > { %v821_v51 = vadd.f32 %v3168_v49, %v3134_v57  ;;  %v4450_v8 = vadd.f32 %v1123_v7, %v781_v2 }
 0x114   : > { %v812_v39 = vpop.f32.mrf.mxu1  ;;  %v3197_v19 = vpop.f32.mrf.mxu0  ;;  %3400 = vmatmul.mubr.msk.bf16.gmra.mxu0 %vm478_vm2, %v4167_v23 }
 0x115   : > { %v813_v34 = vadd.f32 %v812_v39, %v600_v15  ;;  %v4454_v43 = vadd.f32 %v3197_v19, %v802_v45  ;;  %3403 = vmatprep.mubr.msk.bf16.mxu0 %vm478_vm2, %v4169_v40 }
 0x116   : > { %v3171_v48 = vpop.f32.mrf.mxu1  ;;  %3374 = vmatmul.mubr.msk.bf16.gmra.mxu1 %vm478_vm2, %v5069_v26  ;;  %v1136_v38 = vpop.f32.mrf.mxu0 }
 0x117   : > { %v834_v63 = vadd.f32 %v3171_v48, %v3137_v28  ;;  %v4460_v57 = vadd.f32 %v1136_v38, %v794_v30  ;;  %3377 = vmatprep.mubr.msk.bf16.mxu1 %vm478_vm2, %v5070_v1 }
 0x118   : > { %v825_v36 = vpop.f32.mrf.mxu1  ;;  %v3198_v2 = vpop.f32.mrf.mxu0 }
 0x119   : > { %v826_v23 = vadd.f32 %v825_v36, %v613_v13  ;;  %v4464_v15 = vadd.f32 %v3198_v2, %v805_v55 }
 0x11a   : > { %v3172_v45 = vpop.f32.mrf.mxu1  ;;  %v1139_v19 = vpop.f32.mrf.mxu0 }
 0x11b   : > { %v837_v61 = vadd.f32 %v3172_v45, %v3138_v3  ;;  %v4466_v40 = vadd.f32 %v1139_v19, %v797_v12 }
 0x11c   : > { %v828_v11 = vpop.f32.mrf.mxu1  ;;  %v3201_v24 = vpop.f32.mrf.mxu0  ;;  %3404 = vmatmul.mubr.msk.bf16.gmra.mxu0 %vm478_vm2, %v4193_v21 }
 0x11d   : > { %v829_v26 = vadd.f32 %v828_v11, %v616_v6  ;;  %v4470_v28 = vadd.f32 %v3201_v24, %v818_v29  ;;  %3407 = vmatprep.mubr.msk.bf16.mxu0 %vm478_vm2, %v4195_v46 }
 0x11e   : > { %v3175_v1 = vpop.f32.mrf.mxu1  ;;  %3378 = vmatmul.mubr.msk.bf16.gmra.mxu1 %vm478_vm2, %v5071_v35  ;;  %v1152_v13 = vpop.f32.mrf.mxu0 }
 0x11f   : > { %v850_v3 = vadd.f32 %v3175_v1, %v4423_v58  ;;  %v4477_v30 = vadd.f32 %v1152_v13, %v810_v60  ;;  %3381 = vmatprep.mubr.msk.bf16.mxu1 %vm478_vm2, %v5072_v32 }
 0x120   : > { %v841_v55 = vpop.f32.mrf.mxu1  ;;  %v3202_v21 = vpop.f32.mrf.mxu0 }
 0x121   : > { %v4481_v6 = vadd.f32 %v3202_v21, %v821_v51 }
 0x122   : > { %v3176_v12 = vpop.f32.mrf.mxu1  ;;  %v1155_v29 = vpop.f32.mrf.mxu0 }
 0x123   : > { %v853_v56 = vadd.f32 %v3176_v12, %v3142_v18  ;;  %v4483_v46 = vadd.f32 %v1155_v29, %v813_v34 }
 0x124   : > { %v844_v49 = vpop.f32.mrf.mxu1  ;;  %v3205_v35 = vpop.f32.mrf.mxu0  ;;  %3408 = vmatmul.mubr.msk.bf16.gmra.mxu0 %vm478_vm2, %v4210_v62 }
 0x125   : > { %v845_v58 = vadd.f32 %v844_v49, %v4434_v44  ;;  %v4488_v60 = vadd.f32 %v3205_v35, %v834_v63  ;;  %3411 = vmatprep.mubr.msk.bf16.mxu0 %vm478_vm2, %v4091_v25  ;;  %v4500_v44 = vld [vmem:[%s3677_s15 + $0x1a8] sm:$0x3]  ;;  %v2107_v25 = vrot.slane %v4412_v0, 1  ;;  %v2108_v63 = vrot.slane %v4415_v17, 1 }
 0x126   : > { %v3179_v32 = vpop.f32.mrf.mxu1  ;;  %3382 = vmatmul.mubr.msk.bf16.gmra.mxu1 %vm478_vm2, %v5073_v27  ;;  %v1168_v18 = vpop.f32.mrf.mxu0  ;;  %v2316_v35 = vrot.slane %v4412_v0, 2  ;;  %v5084_v0 = vld [vmem:[#allocation8_spill] sm:$0xff] }
 0x127   : > { %v866_v7 = vadd.f32 %v3179_v32, %v4359_v41  ;;  %v4495_v51 = vadd.f32 %v1168_v18, %v826_v23  ;;  %3385 = vmatprep.mubr.msk.bf16.mxu1 %vm478_vm2, %v5074_v47  ;;  %v2110_v47 = vrot.slane %v4500_v44, 1 }
 0x128   : > { %v857_v62 = vpop.f32.mrf.mxu1  ;;  %v3206_v39 = vpop.f32.mrf.mxu0 }
 0x129   : > { %v858_v34 = vadd.f32 %v857_v62, %v4365_v14  ;;  %v4503_v48 = vadd.f32 %v3206_v39, %v837_v61  ;;  %v842_v14 = vadd.f32 %v841_v55, %v4430_v31 }
 0x12a   : > { %v3180_v38 = vpop.f32.mrf.mxu1  ;;  %v1171_v27 = vpop.f32.mrf.mxu0 }
 0x12b   : > { %v869_v41 = vadd.f32 %v3180_v38, %v4367_v5  ;;  %v4508_v36 = vadd.f32 %v1171_v27, %v829_v26 }
 0x12c   : > { %v860_v2 = vpop.f32.mrf.mxu1  ;;  %v3209_v23 = vpop.f32.mrf.mxu0  ;;  %3412 = vmatmul.mubr.msk.bf16.gmra.mxu0 %vm478_vm2, %v4096_v16  ;;  %v2109_v16 = vsel %vm347_vm1, %v2107_v25, %v2108_v63  ;;  %v5082_v25 = vld [vmem:[#allocation6_spill] sm:$0xff] }
 0x12d   : > { %v861_v45 = vadd.f32 %v860_v2, %v4369_v9  ;;  %v4515_v19 = vadd.f32 %v3209_v23, %v850_v3  ;;  %3415 = vmatprep.mubr.msk.bf16.mxu0 %vm478_vm2, %v4101_v20  ;;  %v2111_v9 = vsel %vm347_vm1, %v2108_v63, %v2110_v47  ;;  %v5083_v63 = vld [vmem:[#allocation21_spill] sm:$0xff]  ;;  %v5085_v2 = vld [vmem:[#allocation14_spill] sm:$0xff] }
 0x12e   : > { %v3183_v61 = vpop.f32.mrf.mxu1  ;;  %3386 = vmatmul.mubr.msk.bf16.gmra.mxu1 %vm478_vm2, %v5075_v59  ;;  %v1184_v5 = vpop.f32.mrf.mxu0  ;;  %v2114_v3 = vpack.c.bf16 %v2111_v9, %v2109_v16 }
 0x12f   : > { %v882_v11 = vadd.f32 %v3183_v61, %v4375_v10  ;;  %v4522_v24 = vadd.f32 %v1184_v5, %v842_v14  ;;  %3389 = vmatprep.mubr.msk.bf16.mxu1 %vm478_vm2, %v4320_v50 }
 0x130   : > { %v873_v31 = vpop.f32.mrf.mxu1  ;;  %v3210_v26 = vpop.f32.mrf.mxu0 }
 0x131   : > { %v874_v20 = vadd.f32 %v873_v31, %v4383_v4  ;;  %v4529_v1 = vadd.f32 %v3210_v26, %v853_v56 }
 0x132   : > { %v3184_v13 = vpop.f32.mrf.mxu1  ;;  %v1187_v59 = vpop.f32.mrf.mxu0 }
 0x133   : > { %v885_v10 = vadd.f32 %v3184_v13, %v4385_v37  ;;  %v4532_v55 = vadd.f32 %v1187_v59, %v845_v58 }
 0x134   : > { %v876_v21 = vpop.f32.mrf.mxu1  ;;  %v3213_v12 = vpop.f32.mrf.mxu0  ;;  %3416 = vmatmul.mubr.msk.bf16.gmra.mxu0 %vm478_vm2, %v4119_v22  ;;  %v2317_v22 = vrot.slane %v4415_v17, 2 }
 0x135   : > { %v877_v50 = vadd.f32 %v876_v21, %v4389_v42  ;;  %v4537_v29 = vadd.f32 %v3213_v12, %v866_v7  ;;  %3419 = vmatprep.mubr.msk.bf16.mxu0 %vm478_vm2, %v4127_v53  ;;  %v5081_v42 = vld [vmem:[#allocation15_spill] sm:$0xff]  ;;  %v2319_v53 = vrot.slane %v4500_v44, 2 }
 0x136   : > { %v3187_v4 = vpop.f32.mrf.mxu1  ;;  %3390 = vmatmul.mubr.msk.bf16.gmra.mxu1 %vm478_vm2, %v2114_v3  ;;  %v1200_v56 = vpop.f32.mrf.mxu0  ;;  %v2318_v44 = vsel %vm904_vm3, %v2316_v35, %v2317_v22 }
 0x137   : > { %v898_v37 = vadd.f32 %v3187_v4, %v4395_v33  ;;  %v4543_v49 = vadd.f32 %v1200_v56, %v858_v34 }
 0x138   : > { %v889_v58 = vpop.f32.mrf.mxu1  ;;  %v3214_v32 = vpop.f32.mrf.mxu0 }
 0x139   : > { %v890_v18 = vadd.f32 %v889_v58, %v5081_v42  ;;  %v4548_v7 = vadd.f32 %v3214_v32, %v869_v41  ;;  %v2320_v41 = vsel %vm904_vm3, %v2317_v22, %v2319_v53 }
 0x13a   : > { %v3188_v62 = vpop.f32.mrf.mxu1  ;;  %v1203_v39 = vpop.f32.mrf.mxu0  ;;  %v2323_v31 = vpack.c.bf16 %v2320_v41, %v2318_v44 }
 0x13b   : > { %v901_v38 = vadd.f32 %v3188_v62, %v5082_v25  ;;  %v4552_v27 = vadd.f32 %v1203_v39, %v861_v45  ;;  %v5086_v45 = vld [vmem:[#allocation10_spill] sm:$0xff] }
 0x13c   : > { %v892_v33 = vpop.f32.mrf.mxu1  ;;  %v3217_v34 = vpop.f32.mrf.mxu0  ;;  %3420 = vmatmul.mubr.msk.bf16.gmra.mxu0 %vm478_vm2, %v5083_v63 }
 0x13d   : > { %v893_v47 = vadd.f32 %v892_v33, %v5084_v0  ;;  %v4557_v17 = vadd.f32 %v3217_v34, %v882_v11  ;;  %3423 = vmatprep.mubr.msk.bf16.mxu0 %vm478_vm2, %v5085_v2 }
 0x13e   : > { %v3227_v23 = vpop.f32.mrf.mxu1  ;;  %v1216_v14 = vpop.f32.mrf.mxu0 }
 0x13f   : > { %v1451_v61 = vadd.f32 %v3227_v23, %v5086_v45  ;;  %v4564_v5 = vadd.f32 %v1216_v14, %v874_v20 }
 0x140   : > { %v1322_v16 = vpop.f32.mrf.mxu1  ;;  %v3218_v9 = vpop.f32.mrf.mxu0 }
 0x141   : > { %v1449_v26 = vadd.f32 %v1322_v16, %v4444_v52  ;;  %v4567_v11 = vadd.f32 %v3218_v9, %v885_v10 }
 0x142   : > { %v3228_v13 = vpop.f32.mrf.mxu1  ;;  %v1219_v59 = vpop.f32.mrf.mxu0 }
 0x143   : > { %v1452_v3 = vadd.f32 %v3228_v13, %v4448_v54  ;;  %v4570_v21 = vadd.f32 %v1219_v59, %v877_v50 }
 0x144   : > { %v1325_v12 = vpop.f32.mrf.mxu1  ;;  %v3221_v4 = vpop.f32.mrf.mxu0  ;;  %3424 = vmatmul.mubr.msk.bf16.gmra.mxu0 %vm478_vm2, %v2323_v31 }
 0x145   : > { %v1450_v20 = vadd.f32 %v1325_v12, %v4450_v8  ;;  %v4574_v56 = vadd.f32 %v3221_v4, %v898_v37 }
 0x146   : > { %v3231_v35 = vpop.f32.mrf.mxu1  ;;  %v1232_v58 = vpop.f32.mrf.mxu0 }
 0x147   : > { %v1455_v52 = vadd.f32 %v3231_v35, %v4454_v43  ;;  %v4577_v10 = vadd.f32 %v1232_v58, %v890_v18 }
 0x148   : > { %v1338_v32 = vpop.f32.mrf.mxu1  ;;  %v3222_v22 = vpop.f32.mrf.mxu0 }
 0x149   : > { %v1453_v54 = vadd.f32 %v1338_v32, %v4460_v57  ;;  %v4580_v50 = vadd.f32 %v3222_v22, %v901_v38 }
 0x14a   : > { %v3232_v42 = vpop.f32.mrf.mxu1  ;;  %v1235_v53 = vpop.f32.mrf.mxu0 }
 0x14b   : > { %v1456_v62 = vadd.f32 %v3232_v42, %v4464_v15  ;;  %v4583_v39 = vadd.f32 %v1235_v53, %v893_v47 }
 0x14c   : > { %v1341_v8 = vpop.f32.mrf.mxu1  ;;  %v3261_v37 = vpop.f32.mrf.mxu0 }
 0x14d   : > { %v1454_v25 = vadd.f32 %v1341_v8, %v4466_v40  ;;  %v4586_v33 = vadd.f32 %v3261_v37, %v1451_v61 }
 0x14e   : > { %v3235_v43 = vpop.f32.mrf.mxu1  ;;  %v1534_v18 = vpop.f32.mrf.mxu0 }
 0x14f   : > { %v1459_v34 = vadd.f32 %v3235_v43, %v4470_v28  ;;  %v4589_v63 = vadd.f32 %v1534_v18, %v1449_v26 }
 0x150   : > { %v1354_v57 = vpop.f32.mrf.mxu1  ;;  %v3262_v38 = vpop.f32.mrf.mxu0 }
 0x151   : > { %v1457_v0 = vadd.f32 %v1354_v57, %v4477_v30  ;;  %v4592_v2 = vadd.f32 %v3262_v38, %v1452_v3 }
 0x152   : > { %v3236_v15 = vpop.f32.mrf.mxu1  ;;  %v1537_v47 = vpop.f32.mrf.mxu0 }
 0x153   : > { %v1460_v44 = vadd.f32 %v3236_v15, %v4481_v6  ;;  %v4595_v41 = vadd.f32 %v1537_v47, %v1450_v20 }
 0x154   : > { %v1357_v40 = vpop.f32.mrf.mxu1  ;;  %v3265_v23 = vpop.f32.mrf.mxu0 }
 0x155   : > { %v1458_v14 = vadd.f32 %v1357_v40, %v4483_v46  ;;  %v4598_v45 = vadd.f32 %v3265_v23, %v1455_v52 }
 0x156   : > { %v3239_v28 = vpop.f32.mrf.mxu1  ;;  %v1550_v61 = vpop.f32.mrf.mxu0 }
 0x157   : > { %v1463_v16 = vadd.f32 %v3239_v28, %v4488_v60  ;;  %v4601_v9 = vadd.f32 %v1550_v61, %v1453_v54 }
 0x158   : > { %v1370_v30 = vpop.f32.mrf.mxu1  ;;  %v3266_v31 = vpop.f32.mrf.mxu0 }
 0x159   : > { %v1461_v26 = vadd.f32 %v1370_v30, %v4495_v51  ;;  %v4604_v13 = vadd.f32 %v3266_v31, %v1456_v62  ;;  %v2648_v31 = vld [vmem:[%s5007_s3 + $0x70] sm:$0xff] }
 0x15a   : > { %v3240_v6 = vpop.f32.mrf.mxu1  ;;  %v1553_v59 = vpop.f32.mrf.mxu0 }
 0x15b   : > { %v1464_v3 = vadd.f32 %v3240_v6, %v4503_v48  ;;  %v4607_v12 = vadd.f32 %v1553_v59, %v1454_v25 }
 0x15c   : > { %v1373_v46 = vpop.f32.mrf.mxu1  ;;  %v3269_v4 = vpop.f32.mrf.mxu0 }
 0x15d   : > { %v1462_v20 = vadd.f32 %v1373_v46, %v4508_v36  ;;  %v4610_v35 = vadd.f32 %v3269_v4, %v1459_v34 }
 0x15e   : > { %v3243_v60 = vpop.f32.mrf.mxu1  ;;  %v1566_v58 = vpop.f32.mrf.mxu0 }
 0x15f   : > { %v1467_v52 = vadd.f32 %v3243_v60, %v4515_v19  ;;  %v4613_v32 = vadd.f32 %v1566_v58, %v1457_v0  ;;  %v2647_v58 = vld [vmem:[%s5007_s3 + $0x68] sm:$0xff] }
 0x160   : > { %v1386_v51 = vpop.f32.mrf.mxu1  ;;  %v3270_v22 = vpop.f32.mrf.mxu0 }
 0x161   : > { %v1465_v54 = vadd.f32 %v1386_v51, %v4522_v24  ;;  %v4616_v42 = vadd.f32 %v3270_v22, %v1460_v44 }
 0x162   : > { %v3244_v48 = vpop.f32.mrf.mxu1  ;;  %v1569_v53 = vpop.f32.mrf.mxu0 }
 0x163   : > { %v1468_v62 = vadd.f32 %v3244_v48, %v4529_v1  ;;  %v4619_v8 = vadd.f32 %v1569_v53, %v1458_v14  ;;  %v3578_v14 = vmov 0.0  }
 0x164   : > { %v1389_v36 = vpop.f32.mrf.mxu1  ;;  %v3273_v37 = vpop.f32.mrf.mxu0  ;;  %3427 = vmatprep.subr.mxu1 %v3578_v14  ;;  %3459 = vmatprep.mubr.msk.f32.mxu1 %vm3579_vm4, %v3578_v14 }
 0x165   : > { %v1466_v25 = vadd.f32 %v1389_v36, %v4532_v55  ;;  %v4622_v43 = vadd.f32 %v3273_v37, %v1463_v16  ;;  %v2649_v55 = vld [vmem:[%s5007_s3 + $0x78] sm:$0xff] }
 0x166   : > { %v3247_v19 = vpop.f32.mrf.mxu1  ;;  %v1582_v18 = vpop.f32.mrf.mxu0  ;;  %3428 = vmatpush3.msra.mxu1 %v2649_v55 }
 0x167   : > { %v1471_v34 = vadd.f32 %v3247_v19, %v4537_v29  ;;  %v4625_v57 = vadd.f32 %v1582_v18, %v1461_v26  ;;  %3429 = vmatprep.subr.mxu1 %v3578_v14 }
 0x168   : > { %v1402_v24 = vpop.f32.mrf.mxu1  ;;  %v3274_v38 = vpop.f32.mrf.mxu0  ;;  %3430 = vmatpush3.msra.mxu1 %v2648_v31 }
 0x169   : > { %v1469_v0 = vadd.f32 %v1402_v24, %v4543_v49  ;;  %v4628_v15 = vadd.f32 %v3274_v38, %v1464_v3  ;;  %3431 = vmatprep.subr.mxu1 %v3578_v14  ;;  %v2645_v24 = vld [vmem:[%s5007_s3 + $0x58] sm:$0xff] }
 0x16a   : > { %v3248_v1 = vpop.f32.mrf.mxu1  ;;  %v1585_v47 = vpop.f32.mrf.mxu0  ;;  %3432 = vmatpush3.msra.mxu1 %v2647_v58 }
 0x16b   : > { %v1472_v44 = vadd.f32 %v3248_v1, %v4548_v7  ;;  %v4631_v40 = vadd.f32 %v1585_v47, %v1462_v20  ;;  %3433 = vmatprep.subr.mxu1 %v3578_v14 }
 0x16c   : > { %v1405_v23 = vpop.f32.mrf.mxu1  ;;  %v3277_v29 = vpop.f32.mrf.mxu0 }
 0x16d   : > { %v1470_v28 = vadd.f32 %v1405_v23, %v4552_v27  ;;  %v4638_v49 = vadd.f32 %v3277_v29, %v1467_v52  ;;  %v2644_v23 = vld [vmem:[%s5007_s3 + $0x50] sm:$0xff] }
 0x16e   : > { %v3251_v61 = vpop.f32.mrf.mxu1  ;;  %v1598_v16 = vpop.f32.mrf.mxu0 }
 0x16f   : > { %v1475_v7 = vadd.f32 %v3251_v61, %v4557_v17  ;;  %v4642_v30 = vadd.f32 %v1598_v16, %v1465_v54 }
 0x170   : > { %v1418_v26 = vpop.f32.mrf.mxu1  ;;  %v3278_v6 = vpop.f32.mrf.mxu0 }
 0x171   : > { %v1473_v27 = vadd.f32 %v1418_v26, %v4564_v5  ;;  %v4648_v59 = vadd.f32 %v3278_v6, %v1468_v62  ;;  %v2646_v62 = vld [vmem:[%s5007_s3 + $0x60] sm:$0xff]  ;;  %v2643_v26 = vld [vmem:[%s5007_s3 + $0x48] sm:$0xff] }
 0x172   : > { %v3252_v3 = vpop.f32.mrf.mxu1  ;;  %v1601_v46 = vpop.f32.mrf.mxu0  ;;  %3434 = vmatpush3.msra.mxu1 %v2646_v62 }
 0x173   : > { %v1476_v4 = vadd.f32 %v3252_v3, %v4567_v11  ;;  %v4652_v17 = vadd.f32 %v1601_v46, %v1466_v25  ;;  %3435 = vmatprep.subr.mxu1 %v3578_v14 }
 0x174   : > { %v1421_v20 = vpop.f32.mrf.mxu1  ;;  %v3281_v60 = vpop.f32.mrf.mxu0  ;;  %3436 = vmatpush3.msra.mxu1 %v2645_v24 }
 0x175   : > { %v1474_v52 = vadd.f32 %v1421_v20, %v4570_v21  ;;  %v4658_v51 = vadd.f32 %v3281_v60, %v1471_v34  ;;  %3437 = vmatprep.subr.mxu1 %v3578_v14  ;;  %v2642_v20 = vld [vmem:[%s5007_s3 + $0x40] sm:$0xff] }
 0x176   : > { %v3255_v5 = vpop.f32.mrf.mxu1  ;;  %v1614_v22 = vpop.f32.mrf.mxu0  ;;  %3438 = vmatpush3.msra.mxu1 %v2644_v23 }
 0x177   : > { %v1479_v54 = vadd.f32 %v3255_v5, %v4574_v56  ;;  %v4662_v11 = vadd.f32 %v1614_v22, %v1469_v0  ;;  %3439 = vmatprep.subr.mxu1 %v3578_v14 }
 0x178   : > { %v1434_v48 = vpop.f32.mrf.mxu1  ;;  %v3282_v53 = vpop.f32.mrf.mxu0  ;;  %3440 = vmatpush3.msra.mxu1 %v2643_v26  ;;  %v2639_v26 = vld [vmem:[%s5007_s3 + $0x28] sm:$0xff] }
 0x179   : > { %v1477_v36 = vadd.f32 %v1434_v48, %v4577_v10  ;;  %v4668_v21 = vadd.f32 %v3282_v53, %v1472_v44  ;;  %3441 = vmatprep.subr.mxu1 %v3578_v14  ;;  %v2641_v48 = vld [vmem:[%s5007_s3 + $0x38] sm:$0xff] }
 0x17a   : > { %v3256_v37 = vpop.f32.mrf.mxu1  ;;  %v1617_v25 = vpop.f32.mrf.mxu0  ;;  %3442 = vmatpush3.msra.mxu1 %v2642_v20 }
 0x17b   : > { %v1480_v19 = vadd.f32 %v3256_v37, %v4580_v50  ;;  %v4672_v56 = vadd.f32 %v1617_v25, %v1470_v28  ;;  %3443 = vmatprep.subr.mxu1 %v3578_v14 }
 0x17c   : > { %v1437_v18 = vpop.f32.mrf.mxu1  ;;  %v3285_v34 = vpop.f32.mrf.mxu0  ;;  %3444 = vmatpush3.msra.mxu1 %v2641_v48  ;;  %v2636_v48 = vld [vmem:[%s5007_s3 + $0x10] sm:$0xff] }
 0x17d   : > { %v1478_v38 = vadd.f32 %v1437_v18, %v4583_v39  ;;  %v4678_v10 = vadd.f32 %v3285_v34, %v1475_v7  ;;  %3445 = vmatprep.subr.mxu1 %v3578_v14  ;;  %v2640_v18 = vld [vmem:[%s5007_s3 + $0x30] sm:$0xff] }
 0x17e   : > { %v3295_v0 = vpop.f32.mrf.mxu1  ;;  %v1630_v1 = vpop.f32.mrf.mxu0  ;;  %3446 = vmatpush3.msra.mxu1 %v2640_v18 }
 0x17f   : > { %v1872_v47 = vadd.f32 %v3295_v0, %v4586_v33  ;;  %v4682_v50 = vadd.f32 %v1630_v1, %v1473_v27  ;;  %3447 = vmatprep.subr.mxu1 %v3578_v14 }
 0x180   : > { %v1743_v44 = vpop.f32.mrf.mxu1  ;;  %v3286_v55 = vpop.f32.mrf.mxu0  ;;  %3448 = vmatpush3.msra.mxu1 %v2639_v26 }
 0x181   : > { %5087 = vst [vmem:[#allocation12_spill] sm:$0xff] %v4682_v50  ;;  %v1870_v29 = vadd.f32 %v1743_v44, %v4589_v63  ;;  %v4688_v39 = vadd.f32 %v3286_v55, %v1476_v4  ;;  %3449 = vmatprep.subr.mxu1 %v3578_v14 }
 0x182   : > { %v3296_v28 = vpop.f32.mrf.mxu1  ;;  %v1633_v61 = vpop.f32.mrf.mxu0 }
 0x183   : > { %v1873_v16 = vadd.f32 %v3296_v28, %v4592_v2  ;;  %v4692_v33 = vadd.f32 %v1633_v61, %v1474_v52 }
 0x184   : > { %v4694_v7 = vpop.f32.mrf.mxu1  ;;  %v3289_v31 = vpop.f32.mrf.mxu0 }
 0x185   : > { %5088 = vst [vmem:[#allocation16_spill] sm:$0xff] %v4692_v33  ;;  %v4699_v6 = vadd.f32 %v3289_v31, %v1479_v54 }
 0x186   : > { %v3299_v63 = vpop.f32.mrf.mxu1  ;;  %v1646_v27 = vpop.f32.mrf.mxu0 }
 0x187   : > { %v1876_v3 = vadd.f32 %v3299_v63, %v4598_v45  ;;  %v4703_v46 = vadd.f32 %v1646_v27, %v1477_v36 }
 0x188   : > { %v4705_v2 = vpop.f32.mrf.mxu1  ;;  %v3290_v4 = vpop.f32.mrf.mxu0 }
 0x189   : > { %5089 = vst [vmem:[#allocation18_spill] sm:$0xff] %v4703_v46  ;;  %v4710_v60 = vadd.f32 %v3290_v4, %v1480_v19 }
 0x18a   : > { %v3300_v58 = vpop.f32.mrf.mxu1  ;;  %v1649_v52 = vpop.f32.mrf.mxu0 }
 0x18b   : > { %v1877_v5 = vadd.f32 %v3300_v58, %v4604_v13  ;;  %v4714_v22 = vadd.f32 %v1649_v52, %v1478_v38  ;;  %v2637_v58 = vld [vmem:[%s5007_s3 + $0x18] sm:$0xff] }
 0x18c   : > { %v4716_v45 = vpop.f32.mrf.mxu1  ;;  %v3329_v54 = vpop.f32.mrf.mxu0 }
 0x18d   : > { %5090 = vst [vmem:[#allocation19_spill] sm:$0xff] %v4714_v22  ;;  %v4721_v53 = vadd.f32 %v3329_v54, %v1872_v47 }
 0x18e   : > { %v3303_v62 = vpop.f32.mrf.mxu1  ;;  %v1945_v36 = vpop.f32.mrf.mxu0 }
 0x18f   : > { %v1880_v37 = vadd.f32 %v3303_v62, %v4610_v35  ;;  %v4725_v25 = vadd.f32 %v1945_v36, %v1870_v29 }
 0x190   : > { %v4727_v13 = vpop.f32.mrf.mxu1  ;;  %v3330_v19 = vpop.f32.mrf.mxu0 }
 0x191   : > { %v4732_v34 = vadd.f32 %v3330_v19, %v1873_v16 }
 0x192   : > { %v3304_v24 = vpop.f32.mrf.mxu1  ;;  %v4734_v38 = vpop.f32.mrf.mxu0 }
 0x193   : > { %v1881_v0 = vadd.f32 %v3304_v24, %v4616_v42  ;;  %v2634_v24 = vld [vmem:[%s5007_s3] sm:$0xff] }
 0x194   : > { %v4738_v35 = vpop.f32.mrf.mxu1  ;;  %v3333_v1 = vpop.f32.mrf.mxu0 }
 0x195   : > { %v4740_v47 = vadd.f32 %v3333_v1, %v1876_v3 }
 0x196   : > { %v3307_v44 = vpop.f32.mrf.mxu1  ;;  %v4742_v55 = vpop.f32.mrf.mxu0 }
 0x197   : > { %v1884_v23 = vadd.f32 %v3307_v44, %v4622_v43  ;;  %v2638_v43 = vld [vmem:[%s5007_s3 + $0x20] sm:$0xff] }
 0x198   : > { %v4745_v29 = vpop.f32.mrf.mxu1  ;;  %v3334_v28 = vpop.f32.mrf.mxu0  ;;  %3450 = vmatpush3.msra.mxu1 %v2638_v43 }
 0x199   : > { %v4747_v61 = vadd.f32 %v3334_v28, %v1877_v5  ;;  %3451 = vmatprep.subr.mxu1 %v3578_v14 }
 0x19a   : > { %v3308_v16 = vpop.f32.mrf.mxu1  ;;  %v4749_v31 = vpop.f32.mrf.mxu0  ;;  %3452 = vmatpush3.msra.mxu1 %v2637_v58 }
 0x19b   : > { %v1885_v42 = vadd.f32 %v3308_v16, %v4628_v15  ;;  %3453 = vmatprep.subr.mxu1 %v3578_v14 }
 0x19c   : > { %v4755_v63 = vpop.f32.mrf.mxu1  ;;  %v3337_v27 = vpop.f32.mrf.mxu0  ;;  %3454 = vmatpush3.msra.mxu1 %v2636_v48 }
 0x19d   : > { %v4757_v3 = vadd.f32 %v3337_v27, %v1880_v37  ;;  %3455 = vmatprep.subr.mxu1 %v3578_v14  ;;  %v2635_v37 = vld [vmem:[%s5007_s3 + $0x8] sm:$0xff] }
 0x19e   : > { %v3311_v4 = vpop.f32.mrf.mxu1  ;;  %v4763_v20 = vpop.f32.mrf.mxu0  ;;  %3456 = vmatpush3.msra.mxu1 %v2635_v37 }
 0x19f   : > { %v1888_v15 = vadd.f32 %v3311_v4, %v4638_v49  ;;  %3457 = vmatprep.subr.mxu1 %v3578_v14 }
 0x1a0   : > { %v4770_v52 = vpop.f32.mrf.mxu1  ;;  %v3338_v5 = vpop.f32.mrf.mxu0  ;;  %3458 = vmatpush3.msra.mxu1 %v2634_v24 }
 0x1a1   : > { %v4772_v54 = vadd.f32 %v3338_v5, %v1881_v0 }
 0x1a2   : > { %v3312_v62 = vpop.f32.mrf.mxu1  ;;  %v4778_v49 = vpop.f32.mrf.mxu0 }
 0x1a3   : > { %v1889_v36 = vadd.f32 %v3312_v62, %v4648_v59 }
 0x1a4   : > { %v4785_v19 = vpop.f32.mrf.mxu1  ;;  %v3341_v18 = vpop.f32.mrf.mxu0 }
 0x1a5   : > { %v4790_v0 = vadd.f32 %v3341_v18, %v1884_v23 }
 0x1a6   : > { %v3315_v59 = vpop.f32.mrf.mxu1  ;;  %v4794_v1 = vpop.f32.mrf.mxu0 }
 0x1a7   : > { %v1892_v44 = vadd.f32 %v3315_v59, %v4658_v51 }
 0x1a8   : > { %v4797_v28 = vpop.f32.mrf.mxu1  ;;  %v3342_v16 = vpop.f32.mrf.mxu0 }
 0x1a9   : > { %v4799_v26 = vadd.f32 %v3342_v16, %v1885_v42 }
 0x1aa   : > { %v3316_v27 = vpop.f32.mrf.mxu1  ;;  %v4801_v43 = vpop.f32.mrf.mxu0 }
 0x1ab   : > { %v1893_v23 = vadd.f32 %v3316_v27, %v4668_v21 }
 0x1ac   : > { %v4804_v4 = vpop.f32.mrf.mxu1  ;;  %v3345_v58 = vpop.f32.mrf.mxu0 }
 0x1ad   : > { %5091 = vst [vmem:[#allocation20_spill] sm:$0xff] %v4804_v4  ;;  %v4806_v14 = vadd.f32 %v3345_v58, %v1888_v15 }
 0x1ae   : > { %v3319_v5 = vpop.f32.mrf.mxu1  ;;  %v4808_v48 = vpop.f32.mrf.mxu0 }
 0x1af   : > { %v1896_v51 = vadd.f32 %v3319_v5, %v4678_v10 }
 0x1b0   : > { %v4811_v62 = vpop.f32.mrf.mxu1  ;;  %v3346_v37 = vpop.f32.mrf.mxu0 }
 0x1b1   : > { %5092 = vst [vmem:[#allocation5_spill] sm:$0xff] %v4811_v62  ;;  %v4813_v42 = vadd.f32 %v3346_v37, %v1889_v36 }
 0x1b2   : > { %v3320_v18 = vpop.f32.mrf.mxu1  ;;  %v4815_v24 = vpop.f32.mrf.mxu0 }
 0x1b3   : > { %v1897_v21 = vadd.f32 %v3320_v18, %v4688_v39 }
 0x1b4   : > { %v4818_v59 = vpop.f32.mrf.mxu1  ;;  %v3349_v16 = vpop.f32.mrf.mxu0 }
 0x1b5   : > { %5093 = vst [vmem:[#allocation7_spill] sm:$0xff] %v4818_v59  ;;  %v4820_v15 = vadd.f32 %v3349_v16, %v1892_v44 }
 0x1b6   : > { %v3323_v27 = vpop.f32.mrf.mxu1  ;;  %v4822_v58 = vpop.f32.mrf.mxu0 }
 0x1b7   : > { %5094 = vst [vmem:[#allocation9_spill] sm:$0xff] %v4820_v15  ;;  %v1900_v10 = vadd.f32 %v3323_v27, %v4699_v6 }
 0x1b8   : > { %v4825_v5 = vpop.f32.mrf.mxu1  ;;  %v3350_v22 = vpop.f32.mrf.mxu0 }
 0x1b9   : > { %5095 = vst [vmem:[#allocation11_spill] sm:$0xff] %v4825_v5  ;;  %v4827_v36 = vadd.f32 %v3350_v22, %v1893_v23 }
 0x1ba   : > { %v3324_v37 = vpop.f32.mrf.mxu1  ;;  %v4829_v46 = vpop.f32.mrf.mxu0 }
 0x1bb   : > { %5096 = vst [vmem:[#allocation13_spill] sm:$0xff] %v4827_v36  ;;  %5097 = vst [vmem:[#allocation17_spill] sm:$0xff] %v4829_v46  ;;  %v1901_v39 = vadd.f32 %v3324_v37, %v4710_v60 }
 0x1bc   : > { %v4832_v18 = vpop.f32.mrf.mxu1  ;;  %v3353_v59 = vpop.f32.mrf.mxu0 }
 0x1bd   : > { %5098 = vst [vmem:[#allocation15_spill] sm:$0xff] %v4832_v18  ;;  %v4834_v44 = vadd.f32 %v3353_v59, %v1896_v51 }
 0x1be   : > { %v3363_v16 = vpop.f32.mrf.mxu1  ;;  %v4836_v33 = vpop.f32.mrf.mxu0 }
 0x1bf   : > { %5099 = vst [vmem:[#allocation6_spill] sm:$0xff] %v4834_v44  ;;  %5100 = vst [vmem:[#allocation21_spill] sm:$0xff] %v4836_v33 }
 0x1c0   : > { %v2157_v62 = vpop.f32.mrf.mxu1  ;;  %v3354_v6 = vpop.f32.mrf.mxu0 }
 0x1c1   : > { %v4838_v27 = vadd.f32 %v3354_v6, %v1897_v21  ;;  %v1871_v6 = vadd.f32 %v4694_v7, %v4595_v41  ;;  %v4861_v41 = vld [vmem:[%s5006_s2] ss:$0 sm:$0xff] }
 0x1c2   : > { %v3364_v5 = vpop.f32.mrf.mxu1  ;;  %v4840_v22 = vpop.f32.mrf.mxu0 }
 0x1c3   : > { %5101 = vst [vmem:[#allocation8_spill] sm:$0xff] %v4838_v27  ;;  %5102 = vst [vmem:[#allocation14_spill] sm:$0xff] %v4840_v22  ;;  %v2284_v27 = vadd.f32 %v2157_v62, %v4725_v25 }
 0x1c4   : > { %v2160_v23 = vpop.f32.mrf.mxu1  ;;  %v3357_v36 = vpop.f32.mrf.mxu0 }
 0x1c5   : > { %v4842_v50 = vadd.f32 %v3357_v36, %v1900_v10  ;;  %v2073_v36 = vadd.f32 %v4734_v38, %v1871_v6 }
 0x1c6   : > { %v3367_v60 = vpop.f32.mrf.mxu1  ;;  %v4844_v37 = vpop.f32.mrf.mxu0 }
 0x1c7   : > { %5103 = vst [vmem:[#allocation10_spill] sm:$0xff] %v4842_v50  ;;  %5104 = vst [vmem:[#allocation22_spill] sm:$0xff] %v4844_v37  ;;  %v2286_v50 = vadd.f32 %v3363_v16, %v4721_v53 }
 0x1c8   : > { %v2173_v18 = vpop.f32.mrf.mxu1  ;;  %v3358_v51 = vpop.f32.mrf.mxu0 }
 0x1c9   : > { %v4846_v59 = vadd.f32 %v3358_v51, %v1901_v39  ;;  %v1874_v51 = vadd.f32 %v4705_v2, %v4601_v9  ;;  %v1875_v9 = vadd.f32 %v4716_v45, %v4607_v12 }
 0x1ca   : > { %v3368_v44 = vpop.f32.mrf.mxu1  ;;  %v4848_v33 = vpop.f32.mrf.mxu0 }
 0x1cb   : > { %5105 = vst [vmem:[#allocation23_spill] sm:$0xff] %v4846_v59  ;;  %5106 = vst [vmem:[#allocation24_spill] sm:$0xff] %v4848_v33  ;;  %v2287_v59 = vadd.f32 %v3364_v5, %v4732_v34  ;;  %v2285_v33 = vadd.f32 %v2160_v23, %v2073_v36  ;;  %v2076_v38 = vadd.f32 %v4742_v55, %v1874_v51 }
 0x1cc   : > { %v2176_v15 = vpop.f32.mrf.mxu1  ;;  %v3397_v21 = vpop.f32.mrf.mxu0  ;;  %v2077_v23 = vadd.f32 %v4749_v31, %v1875_v9  ;;  %v2291_v12 = vadd.f32 %v3368_v44, %v4747_v61  ;;  %v1879_v61 = vadd.f32 %v4738_v35, %v4619_v8 }
 0x1cd   : > { %v2495_v4 = vadd.f32 %v3397_v21, %v2286_v50  ;;  %v2288_v5 = vadd.f32 %v2173_v18, %v2076_v38  ;;  %v2290_v21 = vadd.f32 %v3367_v60, %v4740_v47  ;;  %v1878_v47 = vadd.f32 %v4727_v13, %v4613_v32 }
 0x1ce   : > { %v3371_v22 = vpop.f32.mrf.mxu1  ;;  %v2366_v10 = vpop.f32.mrf.mxu0  ;;  %v2289_v45 = vadd.f32 %v2176_v15, %v2077_v23  ;;  %v2081_v32 = vadd.f32 %v4778_v49, %v1879_v61 }
 0x1cf   : > { %v2493_v37 = vadd.f32 %v2366_v10, %v2284_v27  ;;  %v2534_v50 = vadd.f32 %v4861_v41, %v2495_v4  ;;  %v2080_v15 = vadd.f32 %v4763_v20, %v1878_v47  ;;  %v1882_v20 = vadd.f32 %v4745_v29, %v4625_v57 }
 0x1d0   : > { %v2189_v46 = vpop.f32.mrf.mxu1  ;;  %v3398_v39 = vpop.f32.mrf.mxu0 }
 0x1d1   : > { %v2532_v53 = vadd.f32 %v4861_v41, %v2493_v37  ;;  %v2496_v62 = vadd.f32 %v3398_v39, %v2287_v59  ;;  %v2566_v4 = vmax.f32 %v2534_v50, 0.0  ;;  %v2292_v13 = vadd.f32 %v2189_v46, %v2080_v15 }
 0x1d2   : > { %v3372_v7 = vpop.f32.mrf.mxu1  ;;  %v2369_v25 = vpop.f32.mrf.mxu0 }
 0x1d3   : > { %v2494_v16 = vadd.f32 %v2369_v25, %v2285_v33  ;;  %v2564_v37 = vmax.f32 %v2532_v53, 0.0  ;;  %v2535_v33 = vadd.f32 %v4861_v41, %v2496_v62 }
 0x1d4   : > { %v2192_v2 = vpop.f32.mrf.mxu1  ;;  %v3401_v34 = vpop.f32.mrf.mxu0 }
 0x1d5   : > { %v2533_v27 = vadd.f32 %v4861_v41, %v2494_v16  ;;  %v2499_v51 = vadd.f32 %v3401_v34, %v2290_v21  ;;  %v2567_v38 = vmax.f32 %v2535_v33, 0.0  ;;  %v2295_v33 = vadd.f32 %v3372_v7, %v4772_v54 }
 0x1d6   : > { %v4871_v6 = vpop.f32.mrf.mxu1  ;;  %v2382_v55 = vpop.f32.mrf.mxu0 }
 0x1d7   : > { %v2565_v59 = vmax.f32 %v2533_v27, 0.0  ;;  %v2497_v10 = vadd.f32 %v2382_v55, %v2288_v5  ;;  %v2538_v34 = vadd.f32 %v4861_v41, %v2499_v51  ;;  %v2294_v55 = vadd.f32 %v3371_v22, %v4757_v3 }
 0x1d8   : > { %v2205_v18 = vpop.f32.mrf.mxu1  ;;  %v3402_v36 = vpop.f32.mrf.mxu0 }
 0x1d9   : > { %v2596_v39 = vadd.f32 %v2565_v59, %v2564_v37  ;;  %v2536_v31 = vadd.f32 %v4861_v41, %v2497_v10  ;;  %v2500_v62 = vadd.f32 %v3402_v36, %v2291_v12  ;;  %v2570_v49 = vmax.f32 %v2538_v34, 0.0 }
 0x1da   : > { %v3376_v60 = vpop.f32.mrf.mxu1  ;;  %v2385_v25 = vpop.f32.mrf.mxu0 }
 0x1db   : > { %v2597_v53 = vadd.f32 %v2596_v39, %v2566_v4  ;;  %v2498_v16 = vadd.f32 %v2385_v25, %v2289_v45  ;;  %v2568_v5 = vmax.f32 %v2536_v31, 0.0  ;;  %v2539_v8 = vadd.f32 %v4861_v41, %v2500_v62 }
 0x1dc   : > { %v2208_v44 = vpop.f32.mrf.mxu1  ;;  %v3405_v9 = vpop.f32.mrf.mxu0  ;;  %v2293_v45 = vadd.f32 %v2192_v2, %v2081_v32  ;;  %v2084_v4 = vadd.f32 %v4794_v1, %v1882_v20  ;;  %v1883_v1 = vadd.f32 %v4755_v63, %v4631_v40  ;;  %v1886_v32 = vadd.f32 %v4770_v52, %v4642_v30 }
 0x1dd   : > { %v2598_v50 = vadd.f32 %v2597_v53, %v2567_v38  ;;  %v2537_v27 = vadd.f32 %v4861_v41, %v2498_v16  ;;  %v2503_v36 = vadd.f32 %v3405_v9, %v2294_v55  ;;  %v2571_v51 = vmax.f32 %v2539_v8, 0.0 }
 0x1de   : > { %v4884_v23 = vpop.f32.mrf.mxu1  ;;  %v2398_v21 = vpop.f32.mrf.mxu0  ;;  %v2296_v57 = vadd.f32 %v2205_v18, %v2084_v4  ;;  %v2085_v18 = vadd.f32 %v4801_v43, %v1883_v1  ;;  %v2088_v43 = vadd.f32 %v4808_v48, %v1886_v32  ;;  %v1887_v30 = vadd.f32 %v4785_v19, %v4652_v17  ;;  %v5109_v32 = vld [vmem:[#allocation9_spill] sm:$0xff] }
 0x1df   : > { %v2599_v37 = vadd.f32 %v2598_v50, %v2568_v5  ;;  %v2569_v35 = vmax.f32 %v2537_v27, 0.0  ;;  %v2501_v10 = vadd.f32 %v2398_v21, %v2292_v13  ;;  %v2542_v7 = vadd.f32 %v4861_v41, %v2503_v36 }
 0x1e0   : > { %v2221_v59 = vpop.f32.mrf.mxu1  ;;  %v3406_v12 = vpop.f32.mrf.mxu0  ;;  %v2298_v5 = vadd.f32 %v4871_v6, %v4790_v0  ;;  %v2299_v21 = vadd.f32 %v3376_v60, %v4799_v26  ;;  %v2297_v55 = vadd.f32 %v2208_v44, %v2085_v18  ;;  %v2089_v48 = vadd.f32 %v4815_v24, %v1887_v30  ;;  %v5108_v18 = vld [vmem:[#allocation17_spill] sm:$0xff] }
 0x1e1   : > { %v2600_v46 = vadd.f32 %v2599_v37, %v2569_v35  ;;  %v2540_v3 = vadd.f32 %v4861_v41, %v2501_v10  ;;  %v2504_v47 = vadd.f32 %v3406_v12, %v2295_v33  ;;  %v2574_v13 = vmax.f32 %v2542_v7, 0.0 }
 0x1e2   : > { %v3380_v22 = vpop.f32.mrf.mxu1  ;;  %v2401_v39 = vpop.f32.mrf.mxu0  ;;  %v2300_v52 = vadd.f32 %v2221_v59, %v2088_v43 }
 0x1e3   : > { %v2601_v31 = vadd.f32 %v2600_v46, %v2570_v49  ;;  %v2502_v25 = vadd.f32 %v2401_v39, %v2293_v45  ;;  %v2572_v38 = vmax.f32 %v2540_v3, 0.0  ;;  %v2543_v15 = vadd.f32 %v4861_v41, %v2504_v47 }
 0x1e4   : > { %v2224_v29 = vpop.f32.mrf.mxu1  ;;  %v3409_v54 = vpop.f32.mrf.mxu0  ;;  %v2302_v3 = vadd.f32 %v4884_v23, %v4806_v14 }
 0x1e5   : > { %v2602_v2 = vadd.f32 %v2601_v31, %v2571_v51  ;;  %v2541_v53 = vadd.f32 %v4861_v41, %v2502_v25  ;;  %v2507_v37 = vadd.f32 %v3409_v54, %v2298_v5  ;;  %v2575_v20 = vmax.f32 %v2543_v15, 0.0 }
 0x1e6   : > { %v4897_v62 = vpop.f32.mrf.mxu1  ;;  %v2414_v16 = vpop.f32.mrf.mxu0  ;;  %v1890_v51 = vadd.f32 %v4797_v28, %v4662_v11  ;;  %v2303_v31 = vadd.f32 %v3380_v22, %v4813_v42  ;;  %v2301_v47 = vadd.f32 %v2224_v29, %v2089_v48  ;;  %v5114_v48 = vld [vmem:[#allocation16_spill] sm:$0xff] }
 0x1e7   : > { %v2603_v61 = vadd.f32 %v2602_v2, %v2572_v38  ;;  %v2573_v9 = vmax.f32 %v2541_v53, 0.0  ;;  %v2505_v34 = vadd.f32 %v2414_v16, %v2296_v57  ;;  %v2546_v26 = vadd.f32 %v4861_v41, %v2507_v37  ;;  %v5112_v37 = vld [vmem:[#allocation13_spill] sm:$0xff] }
 0x1e8   : > { %v2237_v50 = vpop.f32.mrf.mxu1  ;;  %v3410_v27 = vpop.f32.mrf.mxu0  ;;  %v2092_v14 = vadd.f32 %v4822_v58, %v1890_v51 }
 0x1e9   : > { %v2604_v40 = vadd.f32 %v2603_v61, %v2573_v9  ;;  %v2544_v63 = vadd.f32 %v4861_v41, %v2505_v34  ;;  %v2508_v0 = vadd.f32 %v3410_v27, %v2299_v21  ;;  %v2578_v25 = vmax.f32 %v2546_v26, 0.0  ;;  %v5107_v61 = vld [vmem:[#allocation20_spill] sm:$0xff]  ;;  %v5111_v21 = vld [vmem:[#allocation5_spill] sm:$0xff] }
 0x1ea   : > { %v3384_v8 = vpop.f32.mrf.mxu1  ;;  %v2417_v35 = vpop.f32.mrf.mxu0  ;;  %v1891_v11 = vadd.f32 %v5107_v61, %v4672_v56  ;;  %v2304_v28 = vadd.f32 %v2237_v50, %v2092_v14  ;;  %v5110_v50 = vld [vmem:[#allocation12_spill] sm:$0xff] }
 0x1eb   : > { %v2605_v33 = vadd.f32 %v2604_v40, %v2574_v13  ;;  %v2506_v10 = vadd.f32 %v2417_v35, %v2297_v55  ;;  %v2576_v45 = vmax.f32 %v2544_v63, 0.0  ;;  %v2547_v39 = vadd.f32 %v4861_v41, %v2508_v0 }
 0x1ec   : > { %v2240_v6 = vpop.f32.mrf.mxu1  ;;  %v3413_v12 = vpop.f32.mrf.mxu0  ;;  %v2093_v5 = vadd.f32 %v5108_v18, %v1891_v11  ;;  %v2306_v13 = vadd.f32 %v4897_v62, %v5109_v32  ;;  %v1894_v55 = vadd.f32 %v5111_v21, %v5110_v50  ;;  %v2307_v35 = vadd.f32 %v3384_v8, %v5112_v37 }
 0x1ed   : > { %v2606_v49 = vadd.f32 %v2605_v33, %v2575_v20  ;;  %v2545_v60 = vadd.f32 %v4861_v41, %v2506_v10  ;;  %v2511_v54 = vadd.f32 %v3413_v12, %v2302_v3  ;;  %v2579_v2 = vmax.f32 %v2547_v39, 0.0 }
 0x1ee   : > { %v4912_v44 = vpop.f32.mrf.mxu1  ;;  %v2430_v46 = vpop.f32.mrf.mxu0  ;;  %v2305_v43 = vadd.f32 %v2240_v6, %v2093_v5 }
 0x1ef   : > { %v2607_v36 = vadd.f32 %v2606_v49, %v2576_v45  ;;  %v2509_v4 = vadd.f32 %v2430_v46, %v2300_v52  ;;  %v2577_v17 = vmax.f32 %v2545_v60, 0.0  ;;  %v2550_v22 = vadd.f32 %v4861_v41, %v2511_v54  ;;  %v5113_v52 = vld [vmem:[#allocation21_spill] sm:$0xff]  ;;  %v5117_v54 = vld [vmem:[#allocation6_spill] sm:$0xff] }
 0x1f0   : > { %v2253_v19 = vpop.f32.mrf.mxu1  ;;  %v3414_v59 = vpop.f32.mrf.mxu0  ;;  %v2096_v45 = vadd.f32 %v5113_v52, %v1894_v55 }
 0x1f1   : > { %v2608_v57 = vadd.f32 %v2607_v36, %v2577_v17  ;;  %v2548_v24 = vadd.f32 %v4861_v41, %v2509_v4  ;;  %v2512_v1 = vadd.f32 %v3414_v59, %v2303_v31  ;;  %v2582_v20 = vmax.f32 %v2550_v22, 0.0  ;;  %v5115_v36 = vld [vmem:[#allocation7_spill] sm:$0xff]  ;;  %v5116_v31 = vld [vmem:[#allocation14_spill] sm:$0xff] }
 0x1f2   : > { %v3388_v7 = vpop.f32.mrf.mxu1  ;;  %v2433_v38 = vpop.f32.mrf.mxu0  ;;  %v1895_v4 = vadd.f32 %v5115_v36, %v5114_v48  ;;  %v2308_v3 = vadd.f32 %v2253_v19, %v2096_v45  ;;  %v5118_v19 = vld [vmem:[#allocation18_spill] sm:$0xff] }
 0x1f3   : > { %v2510_v23 = vadd.f32 %v2433_v38, %v2301_v47  ;;  %v2609_v53 = vadd.f32 %v2608_v57, %v2578_v25  ;;  %v2580_v29 = vmax.f32 %v2548_v24, 0.0  ;;  %v2551_v63 = vadd.f32 %v4861_v41, %v2512_v1  ;;  %v5120_v1 = vld [vmem:[#allocation8_spill] sm:$0xff] }
 0x1f4   : > { %v3417_v16 = vpop.f32.mrf.mxu0  ;;  %v2256_v9 = vpop.f32.mrf.mxu1  ;;  %v2097_v47 = vadd.f32 %v5116_v31, %v1895_v4  ;;  %v2310_v24 = vadd.f32 %v4912_v44, %v5117_v54 }
 0x1f5   : > { %v2549_v42 = vadd.f32 %v4861_v41, %v2510_v23  ;;  %v2610_v15 = vadd.f32 %v2609_v53, %v2579_v2  ;;  %v2515_v10 = vadd.f32 %v3417_v16, %v2306_v13  ;;  %v2583_v49 = vmax.f32 %v2551_v63, 0.0  ;;  %v5119_v2 = vld [vmem:[#allocation11_spill] sm:$0xff] }
 0x1f6   : > { %v2446_v34 = vpop.f32.mrf.mxu0  ;;  %v3391_v0 = vpop.f32.mrf.mxu1  ;;  %v1898_v53 = vadd.f32 %v5119_v2, %v5118_v19  ;;  %v2311_v16 = vadd.f32 %v3388_v7, %v5120_v1  ;;  %v2309_v61 = vadd.f32 %v2256_v9, %v2097_v47  ;;  %v5122_v13 = vld [vmem:[#allocation19_spill] sm:$0xff] }
 0x1f7   : > { %v2581_v58 = vmax.f32 %v2549_v42, 0.0  ;;  %v2513_v27 = vadd.f32 %v2446_v34, %v2304_v28  ;;  %v2611_v40 = vadd.f32 %v2610_v15, %v2580_v29  ;;  %v2554_v6 = vadd.f32 %v4861_v41, %v2515_v10  ;;  %v5121_v34 = vld [vmem:[#allocation22_spill] sm:$0xff] }
 0x1f8   : > { %v3418_v56 = vpop.f32.mrf.mxu0  ;;  %v2269_v39 = vpop.f32.mrf.mxu1  ;;  %v2100_v18 = vadd.f32 %v5121_v34, %v1898_v53  ;;  %v5125_v10 = vld [vmem:[#allocation10_spill] sm:$0xff] }
 0x1f9   : > { %v2612_v33 = vadd.f32 %v2611_v40, %v2581_v58  ;;  %v2552_v12 = vadd.f32 %v4861_v41, %v2513_v27  ;;  %v2516_v60 = vadd.f32 %v3418_v56, %v2307_v35  ;;  %v2586_v11 = vmax.f32 %v2554_v6, 0.0  ;;  %v5123_v40 = vld [vmem:[#allocation15_spill] sm:$0xff]  ;;  %v5124_v35 = vld [vmem:[#allocation24_spill] sm:$0xff] }
 0x1fa   : > { %v2449_v30 = vpop.f32.mrf.mxu0  ;;  %v3392_v28 = vpop.f32.mrf.mxu1  ;;  %v1899_v63 = vadd.f32 %v5123_v40, %v5122_v13  ;;  %v2312_v56 = vadd.f32 %v2269_v39, %v2100_v18 }
 0x1fb   : > { %v2514_v62 = vadd.f32 %v2449_v30, %v2305_v43  ;;  %v2613_v26 = vadd.f32 %v2612_v33, %v2582_v20  ;;  %v2584_v17 = vmax.f32 %v2552_v12, 0.0  ;;  %v2555_v14 = vadd.f32 %v4861_v41, %v2516_v60 }
 0x1fc   : > { %v3421_v46 = vpop.f32.mrf.mxu0  ;;  %v2272_v9 = vpop.f32.mrf.mxu1  ;;  %v2101_v43 = vadd.f32 %v5124_v35, %v1899_v63  ;;  %v2314_v12 = vadd.f32 %v3391_v0, %v5125_v10 }
 0x1fd   : > { %v2553_v8 = vadd.f32 %v4861_v41, %v2514_v62  ;;  %v2614_v59 = vadd.f32 %v2613_v26, %v2583_v49  ;;  %v2519_v22 = vadd.f32 %v3421_v46, %v2310_v24  ;;  %v2587_v5 = vmax.f32 %v2555_v14, 0.0  ;;  %v5126_v62 = vld [vmem:[#allocation23_spill] sm:$0xff] }
 0x1fe   : > { %v2462_v51 = vpop.f32.mrf.mxu0  ;;  %v2315_v49 = vadd.f32 %v3392_v28, %v5126_v62  ;;  %v2313_v26 = vadd.f32 %v2272_v9, %v2101_v43 }
 0x1ff   : > { %v2585_v25 = vmax.f32 %v2553_v8, 0.0  ;;  %v2517_v57 = vadd.f32 %v2462_v51, %v2308_v3  ;;  %v2615_v38 = vadd.f32 %v2614_v59, %v2584_v17  ;;  %v2558_v50 = vadd.f32 %v4861_v41, %v2519_v22 }
 0x200   : > { %v3422_v23 = vpop.f32.mrf.mxu0 }
 0x201   : > { %v2616_v42 = vadd.f32 %v2615_v38, %v2585_v25  ;;  %v2556_v29 = vadd.f32 %v4861_v41, %v2517_v57  ;;  %v2520_v27 = vadd.f32 %v3422_v23, %v2311_v16  ;;  %v2590_v60 = vmax.f32 %v2558_v50, 0.0 }
 0x202   : > { %v2465_v15 = vpop.f32.mrf.mxu0 }
 0x203   : > { %v2518_v44 = vadd.f32 %v2465_v15, %v2309_v61  ;;  %v2617_v58 = vadd.f32 %v2616_v42, %v2586_v11  ;;  %v2588_v21 = vmax.f32 %v2556_v29, 0.0  ;;  %v2559_v52 = vadd.f32 %v4861_v41, %v2520_v27 }
 0x204   : > { %v3425_v32 = vpop.f32.mrf.mxu0 }
 0x205   : > { %v2557_v7 = vadd.f32 %v4861_v41, %v2518_v44  ;;  %v2618_v55 = vadd.f32 %v2617_v58, %v2587_v5  ;;  %v2523_v48 = vadd.f32 %v3425_v32, %v2314_v12  ;;  %v2591_v8 = vmax.f32 %v2559_v52, 0.0 }
 0x206   : > { %v2478_v37 = vpop.f32.mrf.mxu0 }
 0x207   : > { %v2589_v20 = vmax.f32 %v2557_v7, 0.0  ;;  %v2521_v33 = vadd.f32 %v2478_v37, %v2312_v56  ;;  %v2619_v30 = vadd.f32 %v2618_v55, %v2588_v21  ;;  %v2562_v0 = vadd.f32 %v4861_v41, %v2523_v48 }
 0x208   : > { %v3426_v45 = vpop.f32.mrf.mxu0 }
 0x209   : > { %v2620_v46 = vadd.f32 %v2619_v30, %v2589_v20  ;;  %v2560_v36 = vadd.f32 %v4861_v41, %v2521_v33  ;;  %v2524_v39 = vadd.f32 %v3426_v45, %v2315_v49  ;;  %v2594_v57 = vmax.f32 %v2562_v0, 0.0 }
 0x20a   : > { %v2481_v4 = vpop.f32.mrf.mxu0 }
 0x20b   : > { %v2522_v3 = vadd.f32 %v2481_v4, %v2313_v26  ;;  %v2621_v6 = vadd.f32 %v2620_v46, %v2590_v60  ;;  %v2592_v59 = vmax.f32 %v2560_v36, 0.0  ;;  %v2563_v25 = vadd.f32 %v4861_v41, %v2524_v39 }
 0x20d   : > { %v2561_v17 = vadd.f32 %v4861_v41, %v2522_v3  ;;  %v2622_v51 = vadd.f32 %v2621_v6, %v2591_v8  ;;  %v2595_v24 = vmax.f32 %v2563_v25, 0.0  ;;  %v2650_v41 = vld [vmem:[%s5008_s4] sm:$0x1] }
 0x20f   : > { %v2593_v31 = vmax.f32 %v2561_v17, 0.0  ;;  %v2623_v47 = vadd.f32 %v2622_v51, %v2592_v59 }
 0x211   : > { %v2624_v54 = vadd.f32 %v2623_v47, %v2593_v31 }
 0x213   : > { %v2625_v38 = vadd.f32 %v2624_v54, %v2594_v57 }
 0x215   : > { %v2626_v14 = vadd.f32 %v2625_v38, %v2595_v24 }
 0x217   : > { %v2627_v23 = vrot.slane %v2626_v14, 4 }
 0x219   : > { %v2628_v19 = vadd.f32 %v2627_v23, %v2626_v14 }
 0x21b   : > { %v2629_v2 = vrot.slane %v2628_v19, 2 }
 0x21d   : > { %v2630_v53 = vadd.f32 %v2629_v2, %v2628_v19 }
 0x21f   : > { %v2631_v1 = vrot.slane %v2630_v53, 1 }
 0x221   : > { %v2632_v16 = vadd.f32 %v2631_v1, %v2630_v53 }
 0x223   : > { %v2633_v61 = vmul.f32 0.00390625, %v2632_v16 }
 0x225   : > { %3460 = vmatmul.mubr.f32.vlgmr.msra.gmra.mxu1 %v2633_v61 }
 0x2e5   : > { %v2717_v11 = vpop.f32.mrf.mxu1 }
 0x2e6   : > { %v2718_v28 = vadd.f32 %v2717_v11, %v2650_v41 }
 0x2e7   : > { %v3461_v42 = vpop.f32.mrf.mxu1 }
 0x2e8   : > { %2721 = vst [vmem:[%s219_s23] sm:$0x1] %v2718_v28 }
 0x2e9   : > { %3529 = shalt.err (!%p3526_p3)
}
 0x2ea   : > { %s3530_s11 = scalar_lea.hbm %s4969_s6, 16  ;;  %s3534_s14 = scalar_lea.hbm %s5009_s5, 32 }
 0x2eb   : > { %p3531_p4 = scmp.ne.s32.totalorder %s4969_s6, %s3530_s11  ;;  %p3535_p9 = scmp.lt.s32.totalorder %s4969_s6, %s5009_s5 }
 0x2ec   : > { %p3536_p10 = scmp.lt.s32.totalorder %s3534_s14, %s3530_s11 }
 0x2ed   : > { %p3532_p7 = pnand %p3531_p4, %p3649_p5 }
 0x2ee   : > { %p3537_p11 = por %p3536_p10, %p3535_p9 }
 0x2ef   : > { %p3533_p8 = pneg %p3532_p7 }
 0x2f1   : > { %p3538_p12 = pnand %p3537_p11, %p3533_p8 }
 0x2f3   : > { %3541 = shalt.err (!%p3538_p12)
}
 0x2f4   : > { %3475 = dma.vmem_to_hbm [thread:$0]  (%p3649_p5), %s2736_s25, 16, %s4969_s6, %s2723_s7  }
 0x2f5 PF: > { %p3481_p13 = scmp.ge.s32.totalorder %s3576_s21, 2  ;;  %s2747_s17 = sand.u32 1, %s3564_s18  }
 0x2f6   : > { %s2748_s23 = scalar_lea.sflag [#allocation3], %s2747_s17 }
 0x2f7   : > { %p3478_p0 = pnand %p3481_p13, %p3653_p6 }
 0x2f9   : > { %p3479_p1 = pneg %p3478_p0 }
 0x2fb   : > { %3559 = dma.done.wait (%p3479_p1), %s2748_s23, 16  }
 0x2fc   : > { %3561 = vsyncadd (%p3479_p1), %s2748_s23, 4294967280  ;;  %p15_p2 = scmp.ge.s32.totalorder %s3636_s24, 4   ;;  %s5127_s18 = smov %s3568_s19 }
 0x2fd   : > { %s5128_s19 = smov %s3572_s20  ;;  %s5129_s20 = smov %s3647_s27 }
 0x2fe   : > { %s5130_s21 = smov %s3636_s24  ;;  %17 = sbr.rel (!%p15_p2) target bundleno = 3 (0x3), region = 83 }
 0x303   :  { %2752 = vsyncpa [#allocation3], 1 }
 0x304   :  { %2754 = vsyncpa [#allocation3 + $0x1], 1 }

</bundles_post_ra>
